<compile_context>
chip_gen: v6e
topology: v6e:2x2x1
jax: 0.10.0
libtpu: 0.0.40
codegen_flags: <defaults>
</compile_context>

<pallas_src>
import jax
import jax.numpy as jnp
from jax import lax
from jax.experimental import pallas as pl
from jax.experimental.pallas import tpu as pltpu

_LANE = 128  # lane width / Cout tile


def _round_up(x, m):
    return ((x + m - 1) // m) * m


def _vgg_block_kernel(x_ref, w_ref, b_ref, o_ref):
    # x_ref: (1, H+2, W+2, Cin_p)  bf16  zero-padded input (one batch element)
    # w_ref: (3, 3*Cin_p, TC)      bf16  per-dy dx-folded, BN-scaled weights
    # b_ref: (1, TC)               f32   folded BN bias
    # o_ref: (1, H, W, TC)         f32
    H = o_ref.shape[1]
    W = o_ref.shape[2]
    cin = x_ref.shape[3]
    tc = o_ref.shape[3]

    # Register accumulator (single store at the end, no VMEM RMW traffic).
    acc = jnp.zeros((H * W, tc), dtype=jnp.float32)

    # 3 matmuls, one per dy, with the 3 dx taps folded into K = 3*Cin_p.
    for dy in range(3):
        rows = x_ref[0, dy:dy + H, :, :]  # (H, W+2, Cin_p) — contiguous slice
        patch = jnp.concatenate(
            [rows[:, dx:dx + W, :] for dx in range(3)], axis=-1
        ).reshape(H * W, 3 * cin)  # (H*W, 3*Cin_p) bf16
        acc = acc + jnp.dot(
            patch, w_ref[dy], preferred_element_type=jnp.float32
        )

    # Epilogue: BN bias (scale already folded into weights) + ReLU, fused with
    # the single output store.
    y = acc + b_ref[0, :][None, :]
    y = jnp.maximum(y, 0.0)
    o_ref[...] = y.reshape(1, H, W, tc).astype(o_ref.dtype)


def real_vgg_block(x_nchw, weight_oihw, gamma, beta, running_mean, running_var,
                   eps=1e-5):
    """Fused conv3x3(pad=1, stride=1, no bias) + BN(eval) + ReLU.

    x_nchw:      (N, Cin, H, W)    float32
    weight_oihw: (Cout, Cin, 3, 3) float32
    returns:     (N, Cout, H, W)   float32
    """
    N, Cin, H, W = x_nchw.shape
    Cout = weight_oihw.shape[0]

    cin_p = _round_up(Cin, _LANE)
    cout_p = _round_up(Cout, _LANE)
    TC = _LANE  # Cout tile (lane-dense)

    # Fold BN into the conv: scale goes into the weights, leaving only a bias.
    scale = gamma / jnp.sqrt(running_var + eps)            # (Cout,)
    bias = beta - running_mean * scale                     # (Cout,)
    w_folded = weight_oihw.astype(jnp.float32) * scale[:, None, None, None]

    # OIHW -> HWIO, pad channels, fold dx into K, cast to bf16 for the MXU.
    w_hwio = jnp.transpose(w_folded, (2, 3, 1, 0))          # (3, 3, Cin, Cout)
    w_hwio = jnp.pad(w_hwio,
                     ((0, 0), (0, 0), (0, cin_p - Cin), (0, cout_p - Cout)))
    w_k = w_hwio.reshape(3, 3 * cin_p, cout_p).astype(jnp.bfloat16)

    bias_p = jnp.pad(bias, (0, cout_p - Cout)).reshape(1, cout_p)
    bias_p = bias_p.astype(jnp.float32)

    # NCHW -> NHWC, pad channels to lane multiple, spatial zero-pad by 1, bf16.
    x_nhwc = jnp.transpose(x_nchw, (0, 2, 3, 1))
    x_pad = jnp.pad(x_nhwc, ((0, 0), (1, 1), (1, 1), (0, cin_p - Cin)))
    x_pad = x_pad.astype(jnp.bfloat16)

    # Explicit VMEM budget (double-buffered blocks + headroom), capped sanely.
    block_bytes = (
        (H + 2) * (W + 2) * cin_p * 2       # bf16 input block
        + 3 * (3 * cin_p) * TC * 2          # bf16 weight block
        + TC * 4                            # bias
        + H * W * TC * 4                    # f32 output block
    )
    vmem_limit = int(min(100 * 1024 * 1024,
                         max(32 * 1024 * 1024, 6 * block_bytes)))

    out_nhwc = pl.pallas_call(
        _vgg_block_kernel,
        out_shape=jax.ShapeDtypeStruct((N, H, W, cout_p), jnp.float32),
        grid_spec=pltpu.PrefetchScalarGridSpec(
            num_scalar_prefetch=0,
            grid=(N, cout_p // TC),
            in_specs=[
                pl.BlockSpec((1, H + 2, W + 2, cin_p),
                             lambda n, j: (n, 0, 0, 0)),
                pl.BlockSpec((3, 3 * cin_p, TC),
                             lambda n, j: (0, 0, j)),
                pl.BlockSpec((1, TC),
                             lambda n, j: (0, j)),
            ],
            out_specs=pl.BlockSpec((1, H, W, TC),
                                   lambda n, j: (n, 0, 0, j)),
        ),
        compiler_params=pltpu.CompilerParams(
            dimension_semantics=("parallel", "parallel"),
            vmem_limit_bytes=vmem_limit,
        ),
    )(x_pad, w_k, bias_p)

    # Drop channel padding, NHWC -> NCHW to match PyTorch output convention.
    out = out_nhwc[..., :Cout]
    return jnp.transpose(out, (0, 3, 1, 2))


def _reference(x_nchw, weight_oihw, gamma, beta, running_mean, running_var,
               eps=1e-5):
    """Plain-JAX f32 reference (conv + BN eval + ReLU)."""
    y = lax.conv_general_dilated(
        x_nchw, weight_oihw,
        window_strides=(1, 1),
        padding=((1, 1), (1, 1)),
        dimension_numbers=("NCHW", "OIHW", "NCHW"),
    )
    scale = gamma / jnp.sqrt(running_var + eps)
    bias = beta - running_mean * scale
    y = y * scale[None, :, None, None] + bias[None, :, None, None]
    return jnp.maximum(y, 0.0)


if __name__ == "__main__":
    key = jax.random.PRNGKey(0)
    k_x, k_w, k_g, k_b, k_m, k_v = jax.random.split(key, 6)

    # Small shapes consistent with the module (stride=1, use_post_se=False).
    N, Cin, Cout, H, W = 2, 4, 8, 16, 16

    x = jax.random.normal(k_x, (N, Cin, H, W), dtype=jnp.float32)
    weight = jax.random.normal(k_w, (Cout, Cin, 3, 3), dtype=jnp.float32) * 0.1
    gamma = 1.0 + 0.1 * jax.random.normal(k_g, (Cout,), dtype=jnp.float32)
    beta = 0.1 * jax.random.normal(k_b, (Cout,), dtype=jnp.float32)
    running_mean = 0.1 * jax.random.normal(k_m, (Cout,), dtype=jnp.float32)
    running_var = jnp.abs(jax.random.normal(k_v, (Cout,), dtype=jnp.float32)) + 0.5

    out = real_vgg_block(x, weight, gamma, beta, running_mean, running_var)
    out = jax.block_until_ready(out)

    ref = _reference(x, weight, gamma, beta, running_mean, running_var)
    assert out.shape == (N, Cout, H, W)
    # bf16 MXU inputs (f32 accumulation) -> loosen tolerance vs the f32 reference.
    max_err = float(jnp.max(jnp.abs(out - ref)))
    assert jnp.allclose(out, ref, atol=5e-2, rtol=5e-2), max_err

    print("KERNEL_OK")
</pallas_src>

<mosaic_0001>
module attributes {stable_mosaic.version = 11 : i64} {
  func.func @_vgg_block_kernel(%arg0: i32, %arg1: i32, %arg2: memref<1x18x18x128xbf16, #tpu.memory_space<vmem>>, %arg3: memref<3x384x128xbf16, #tpu.memory_space<vmem>>, %arg4: memref<1x128xf32, #tpu.memory_space<vmem>>, %arg5: memref<1x16x16x128xf32, #tpu.memory_space<vmem>>) attributes {dimension_semantics = [#tpu.dimension_semantics<parallel>, #tpu.dimension_semantics<parallel>], iteration_bounds = array<i64: 2, 1>, scalar_prefetch = 0 : i64, scratch_operands = 0 : i64, tpu.core_type = #tpu.core_type<tc>, window_params = [{transform_indices = @transform_0, window_bounds = array<i64: 1, 18, 18, 128>}, {transform_indices = @transform_1, window_bounds = array<i64: 3, 384, 128>}, {transform_indices = @transform_2, window_bounds = array<i64: 1, 128>}, {transform_indices = @transform_3, window_bounds = array<i64: 1, 16, 16, 128>}]} {
    %cst = arith.constant 0.000000e+00 : f32
    %0 = vector.broadcast %cst : f32 to vector<256x128xf32>
    %c0 = arith.constant 0 : index
    %c0_0 = arith.constant 0 : index
    %c0_1 = arith.constant 0 : index
    %c0_2 = arith.constant 0 : index
    %1 = vector.load %arg2[%c0, %c0_0, %c0_1, %c0_2] : memref<1x18x18x128xbf16, #tpu.memory_space<vmem>>, vector<1x16x18x128xbf16>
    %2 = vector.shape_cast %1 : vector<1x16x18x128xbf16> to vector<16x18x128xbf16>
    %3 = vector.extract_strided_slice %2 {offsets = [0, 0, 0], sizes = [16, 16, 128], strides = [1, 1, 1]} : vector<16x18x128xbf16> to vector<16x16x128xbf16>
    %4 = vector.extract_strided_slice %2 {offsets = [0, 1, 0], sizes = [16, 16, 128], strides = [1, 1, 1]} : vector<16x18x128xbf16> to vector<16x16x128xbf16>
    %5 = vector.extract_strided_slice %2 {offsets = [0, 2, 0], sizes = [16, 16, 128], strides = [1, 1, 1]} : vector<16x18x128xbf16> to vector<16x16x128xbf16>
    %6 = tpu.concatenate %3, %4, %5 in 2 : vector<16x16x128xbf16>, vector<16x16x128xbf16>, vector<16x16x128xbf16> -> vector<16x16x384xbf16>
    %7 = vector.shape_cast %6 : vector<16x16x384xbf16> to vector<256x384xbf16>
    %c0_3 = arith.constant 0 : index
    %c0_4 = arith.constant 0 : index
    %c0_5 = arith.constant 0 : index
    %8 = vector.load %arg3[%c0_3, %c0_4, %c0_5] : memref<3x384x128xbf16, #tpu.memory_space<vmem>>, vector<1x384x128xbf16>
    %9 = vector.shape_cast %8 : vector<1x384x128xbf16> to vector<384x128xbf16>
    %cst_6 = arith.constant dense<0.000000e+00> : vector<256x128xf32>
    %10 = tpu.matmul %7, %9, %cst_6 {dimension_numbers = #tpu.dot_dimension_numbers<[1], [0], [0], [1], [0, 0, 1, 1], [], []>} : vector<256x384xbf16>, vector<384x128xbf16>, vector<256x128xf32> -> vector<256x128xf32>
    %11 = arith.addf %0, %10 : vector<256x128xf32>
    %c0_7 = arith.constant 0 : index
    %c1 = arith.constant 1 : index
    %c0_8 = arith.constant 0 : index
    %c0_9 = arith.constant 0 : index
    %12 = vector.load %arg2[%c0_7, %c1, %c0_8, %c0_9] : memref<1x18x18x128xbf16, #tpu.memory_space<vmem>>, vector<1x16x18x128xbf16>
    %13 = vector.shape_cast %12 : vector<1x16x18x128xbf16> to vector<16x18x128xbf16>
    %14 = vector.extract_strided_slice %13 {offsets = [0, 0, 0], sizes = [16, 16, 128], strides = [1, 1, 1]} : vector<16x18x128xbf16> to vector<16x16x128xbf16>
    %15 = vector.extract_strided_slice %13 {offsets = [0, 1, 0], sizes = [16, 16, 128], strides = [1, 1, 1]} : vector<16x18x128xbf16> to vector<16x16x128xbf16>
    %16 = vector.extract_strided_slice %13 {offsets = [0, 2, 0], sizes = [16, 16, 128], strides = [1, 1, 1]} : vector<16x18x128xbf16> to vector<16x16x128xbf16>
    %17 = tpu.concatenate %14, %15, %16 in 2 : vector<16x16x128xbf16>, vector<16x16x128xbf16>, vector<16x16x128xbf16> -> vector<16x16x384xbf16>
    %18 = vector.shape_cast %17 : vector<16x16x384xbf16> to vector<256x384xbf16>
    %c1_10 = arith.constant 1 : index
    %c0_11 = arith.constant 0 : index
    %c0_12 = arith.constant 0 : index
    %19 = vector.load %arg3[%c1_10, %c0_11, %c0_12] : memref<3x384x128xbf16, #tpu.memory_space<vmem>>, vector<1x384x128xbf16>
    %20 = vector.shape_cast %19 : vector<1x384x128xbf16> to vector<384x128xbf16>
    %cst_13 = arith.constant dense<0.000000e+00> : vector<256x128xf32>
    %21 = tpu.matmul %18, %20, %cst_13 {dimension_numbers = #tpu.dot_dimension_numbers<[1], [0], [0], [1], [0, 0, 1, 1], [], []>} : vector<256x384xbf16>, vector<384x128xbf16>, vector<256x128xf32> -> vector<256x128xf32>
    %22 = arith.addf %11, %21 : vector<256x128xf32>
    %c0_14 = arith.constant 0 : index
    %c2 = arith.constant 2 : index
    %c0_15 = arith.constant 0 : index
    %c0_16 = arith.constant 0 : index
    %23 = vector.load %arg2[%c0_14, %c2, %c0_15, %c0_16] : memref<1x18x18x128xbf16, #tpu.memory_space<vmem>>, vector<1x16x18x128xbf16>
    %24 = vector.shape_cast %23 : vector<1x16x18x128xbf16> to vector<16x18x128xbf16>
    %25 = vector.extract_strided_slice %24 {offsets = [0, 0, 0], sizes = [16, 16, 128], strides = [1, 1, 1]} : vector<16x18x128xbf16> to vector<16x16x128xbf16>
    %26 = vector.extract_strided_slice %24 {offsets = [0, 1, 0], sizes = [16, 16, 128], strides = [1, 1, 1]} : vector<16x18x128xbf16> to vector<16x16x128xbf16>
    %27 = vector.extract_strided_slice %24 {offsets = [0, 2, 0], sizes = [16, 16, 128], strides = [1, 1, 1]} : vector<16x18x128xbf16> to vector<16x16x128xbf16>
    %28 = tpu.concatenate %25, %26, %27 in 2 : vector<16x16x128xbf16>, vector<16x16x128xbf16>, vector<16x16x128xbf16> -> vector<16x16x384xbf16>
    %29 = vector.shape_cast %28 : vector<16x16x384xbf16> to vector<256x384xbf16>
    %c2_17 = arith.constant 2 : index
    %c0_18 = arith.constant 0 : index
    %c0_19 = arith.constant 0 : index
    %30 = vector.load %arg3[%c2_17, %c0_18, %c0_19] : memref<3x384x128xbf16, #tpu.memory_space<vmem>>, vector<1x384x128xbf16>
    %31 = vector.shape_cast %30 : vector<1x384x128xbf16> to vector<384x128xbf16>
    %cst_20 = arith.constant dense<0.000000e+00> : vector<256x128xf32>
    %32 = tpu.matmul %29, %31, %cst_20 {dimension_numbers = #tpu.dot_dimension_numbers<[1], [0], [0], [1], [0, 0, 1, 1], [], []>} : vector<256x384xbf16>, vector<384x128xbf16>, vector<256x128xf32> -> vector<256x128xf32>
    %33 = arith.addf %22, %32 : vector<256x128xf32>
    %c0_21 = arith.constant 0 : index
    %c0_22 = arith.constant 0 : index
    %34 = vector.load %arg4[%c0_21, %c0_22] : memref<1x128xf32, #tpu.memory_space<vmem>>, vector<1x128xf32>
    %35 = vector.shape_cast %34 : vector<1x128xf32> to vector<128xf32>
    %36 = vector.shape_cast %35 : vector<128xf32> to vector<1x128xf32>
    %37 = vector.broadcast %36 : vector<1x128xf32> to vector<256x128xf32>
    %38 = arith.addf %33, %37 : vector<256x128xf32>
    %cst_23 = arith.constant 0.000000e+00 : f32
    %39 = vector.broadcast %cst_23 : f32 to vector<256x128xf32>
    %40 = arith.maximumf %38, %39 : vector<256x128xf32>
    %41 = vector.shape_cast %40 : vector<256x128xf32> to vector<1x16x16x128xf32>
    %c0_24 = arith.constant 0 : index
    %c0_25 = arith.constant 0 : index
    %c0_26 = arith.constant 0 : index
    %c0_27 = arith.constant 0 : index
    %42 = vector.load %arg5[%c0_24, %c0_25, %c0_26, %c0_27] : memref<1x16x16x128xf32, #tpu.memory_space<vmem>>, vector<1x16x16x128xf32>
    tpu.vector_store %arg5[%c0_24, %c0_25, %c0_26, %c0_27], %41 {strides = array<i32>} : memref<1x16x16x128xf32, #tpu.memory_space<vmem>>, vector<1x16x16x128xf32>,
    return
  }
  func.func @transform_0(%arg0: i32, %arg1: i32) -> (i32, i32, i32, i32) {
    %c0_i32 = arith.constant 0 : i32
    %c0_i32_0 = arith.constant 0 : i32
    %c0_i32_1 = arith.constant 0 : i32
    %c0_i32_2 = arith.constant 0 : i32
    return %arg0, %c0_i32, %c0_i32_0, %c0_i32_1 : i32, i32, i32, i32
  }
  func.func @transform_1(%arg0: i32, %arg1: i32) -> (i32, i32, i32) {
    %c0_i32 = arith.constant 0 : i32
    %c0_i32_0 = arith.constant 0 : i32
    %c0_i32_1 = arith.constant 0 : i32
    return %c0_i32, %c0_i32_0, %arg1 : i32, i32, i32
  }
  func.func @transform_2(%arg0: i32, %arg1: i32) -> (i32, i32) {
    %c0_i32 = arith.constant 0 : i32
    %c0_i32_0 = arith.constant 0 : i32
    return %c0_i32, %arg1 : i32, i32
  }
  func.func @transform_3(%arg0: i32, %arg1: i32) -> (i32, i32, i32, i32) {
    %c0_i32 = arith.constant 0 : i32
    %c0_i32_0 = arith.constant 0 : i32
    %c0_i32_1 = arith.constant 0 : i32
    return %arg0, %c0_i32, %c0_i32_0, %arg1 : i32, i32, i32, i32
  }
}

</mosaic_0001>

<bundles_post_ra>
// kernel: tpu_custom_call.1
= control target key start
LH: loop header
LB: loop body
LE: loop exit
PB: predicated region body
PF: predicated region fallthrough
CT: control target
= control target key end

     0   :  { %8 = vsyncpa [#allocation3], 0  ;;  %s6150_s0 = inlined_call_operand.vmem [shape: bf16[2,18,18,128], index: 0, kind: input, shape index: {}]   ;;  %s6151_s1 = inlined_call_operand.vmem [shape: bf16[3,384,128], index: 1, kind: input, shape index: {}]   ;;  %s6152_s2 = inlined_call_operand.vmem [shape: f32[1,128], index: 2, kind: input, shape index: {}]   ;;  %s6153_s3 = inlined_call_operand.hbm [shape: f32[2,16,16,128], index: 3, kind: output, shape index: {}]  }
   0x1   :  { %10 = vsyncpa [#allocation3 + $0x1], 0  ;;  %s4675_s12 = smov 0   ;;  %s4677_s13 = smov 0  }
   0x2   :  { %s4679_s14 = smov 0   ;;  %s4681_s15 = smov 0  }
   0x3   :  { %s4683_s16 = smov 0   ;;  %s4685_s17 = smov 0  }
   0x4 LB: > { %s3404_s18 = sadd.s32 4294967295, %s4650_s17   ;;  %s3405_s19 = sadd.s32 4294967294, %s4650_s17   ;;  %s4650_s17 = sphi %s4685_s17, %s16_s17   ;;  %s4646_s16 = sphi %s4683_s16, %s6190_s16   ;;  %s4642_s15 = sphi %s4681_s15, %s6189_s15   ;;  %s4638_s14 = sphi %s4679_s14, %s6188_s14   ;;  %s4634_s13 = sphi %s4677_s13, %s6187_s13   ;;  %s4630_s12 = sphi %s4675_s12, %s6186_s12  }
   0x5   : > { %s28_s20 = sadd.s32 1, %s4646_s16  ;;  %s115_s21 = sadd.s32 1, %s4638_s14 }
   0x6   : > { %p30_p0 = scmp.ge.s32.totalorder %s28_s20, 2  ;;  %p125_p1 = scmp.ne.s32.totalorder %s4638_s14, %s4634_s13 }
   0x7   : > { %p126_p2 = scmp.eq.s32.totalorder %s3404_s18, 1  ;;  %p131_p3 = scmp.ne.s32.totalorder %s4634_s13, %s4630_s12 }
   0x8   : > { %s6192_s20 = smov (%p30_p0, %s28_s20), 0  ;;  %p132_p5 = scmp.eq.s32.totalorder %s3405_s19, 1 }
   0x9   : > { %p4715_p4 = por %p126_p2, %p125_p1  ;;  %s110_s23 = ssub.s32 %s4646_s16, %s6192_s20 }
   0xa   : > { %p3410_p6 = scmp.ge.s32.totalorder %s4650_s17, 1  ;;  %p113_p7 = scmp.eq.s32.totalorder %s110_s23, 0 }
   0xb   : > { %p4722_p8 = por %p132_p5, %p131_p3  ;;  %p171_p9 = scmp.lt.s32.totalorder %s4650_s17, 3 }
   0xc   : > { %s4728_s25 = scalar_select %p113_p7, %s4638_s14, %s115_s21  }
   0xd   : > { %p172_p10 = pnand %p3410_p6, %p171_p9 }
   0xf   : > { %175 = sbr.rel (%p172_p10) target bundleno = 556 (0x22c), region = 32 }
  0x14   : > { %v4406_v0 = vld [vmem:[%s6151_s1 + $0x138] sm:$0xff]   ;;  %v4408_v2 = vld [vmem:[%s6151_s1 + $0x130] sm:$0xff]   ;;  %p202_p11 = scmp.lt.s32.totalorder %s4642_s15, 1  ;;  %v4410_v4 = vld [vmem:[%s6151_s1 + $0x128] sm:$0xff]   ;;  %vm407_vm0 = vsmask.f32 7424 }
  0x15   : > { %v4407_v1 = vld [vmem:[%s6151_s1 + $0xf8] sm:$0xff]   ;;  %3780 = vmatprep.subr.bf16.mxu0 %v4406_v0  ;;  %4332 = vmatprep.subr.bf16.mxu1 %v4406_v0  ;;  %v4409_v3 = vld [vmem:[%s6151_s1 + $0xf0] sm:$0xff]   ;;  %v4411_v5 = vld [vmem:[%s6151_s1 + $0xe8] sm:$0xff]   ;;  %vm616_vm1 = vcmask 1046528   ;;  %s3779_s7 = sshll.u32 %s4642_s15, 12  ;;  %s4652_s19 = smov [#allocation2]  }
  0x16   : > { %3781 = vmatpush3.bf16.msra.mxu0 %v4407_v1  ;;  %4340 = vmatpush3.bf16.msra.mxu1 %v4407_v1  ;;  %s203_s9 = scalar_select %p202_p11, %s4642_s15, 1  ;;  %v4412_v6 = vld [vmem:[%s6151_s1 + $0x120] sm:$0xff]   ;;  %v4414_v8 = vld [vmem:[%s6151_s1 + $0x118] sm:$0xff]   ;;  %v4416_v10 = vld [vmem:[%s6151_s1 + $0x110] sm:$0xff]  }
  0x17   : > { %3782 = vmatprep.subr.bf16.mxu0 %v4408_v2  ;;  %4333 = vmatprep.subr.bf16.mxu1 %v4408_v2  ;;  %v4413_v7 = vld [vmem:[%s6151_s1 + $0xe0] sm:$0xff]   ;;  %v4415_v9 = vld [vmem:[%s6151_s1 + $0xd8] sm:$0xff]   ;;  %v4417_v11 = vld [vmem:[%s6151_s1 + $0xd0] sm:$0xff]   ;;  %s6097_s11 = scalar_lea.hbm %s6153_s3, %s3779_s7 }
  0x18   : > { %s4348_s21 = smul.u32 216, %s203_s9  ;;  %v4418_v18 = vld [vmem:[%s6151_s1 + $0x108] sm:$0xff]   ;;  %v4420_v26 = vld [vmem:[%s6151_s1 + $0x100] sm:$0xff]   ;;  %v4426_v36 = vld [vmem:[%s6151_s1 + $0x178] sm:$0xff]  }
  0x19   : > { %v4419_v24 = vld [vmem:[%s6151_s1 + $0xc8] sm:$0xff]   ;;  %v4421_v31 = vld [vmem:[%s6151_s1 + $0xc0] sm:$0xff]   ;;  %v4427_v44 = vld [vmem:[%s6151_s1 + $0xb8] sm:$0xff]  }
  0x1a   : > { %3783 = vmatpush3.bf16.msra.mxu0 %v4409_v3  ;;  %4341 = vmatpush3.bf16.msra.mxu1 %v4409_v3  ;;  %s4765_s6 = scalar_lea.vmem %s6150_s0, %s4348_s21  ;;  %v4428_v49 = vld [vmem:[%s6151_s1 + $0x170] sm:$0xff]   ;;  %v4433_v62 = vld [vmem:[%s6151_s1 + $0x168] sm:$0xff]   ;;  %s4578_s21 = sshll.u32 %s4652_s19, 4  ;;  %s4579_s21 = int_to_ptr.vmem [resolvable:$false] %s4578_s21 }
  0x1b   : > { %3784 = vmatprep.subr.bf16.mxu0 %v4410_v4  ;;  %4334 = vmatprep.subr.bf16.mxu1 %v4410_v4  ;;  %v4774_v12 = vld [vmem:[%s4765_s6 + $0xc] sm:$0xff]   ;;  %v4777_v13 = vld [vmem:[%s4765_s6 + $0x14] ss:$0 sps:$4 sm:$0x11]   ;;  %v4783_v17 = vld [vmem:[%s4765_s6 + $0x9c] sm:$0xff]   ;;  %s4580_s23 = scalar_lea.vmem %s4579_s21, 8192 }
  0x1c   : > { %v923_v14 = vshrl.u32 %v4774_v12, 16  ;;  %v925_v15 = vshll.u32 %v4774_v12, 16  ;;  %v930_v16 = vshll.u32 %v4777_v13, 16  ;;  %v4789_v19 = vld [vmem:[%s4765_s6 + $0xa4] ss:$0 sps:$4 sm:$0x11]  }
  0x1d   : > { %v1067_v22 = vshrl.u32 %v4783_v17, 16  ;;  %v1069_v23 = vshll.u32 %v4783_v17, 16  ;;  %v1074_v25 = vshll.u32 %v4789_v19, 16  ;;  %v4801_v30 = vld [vmem:[%s4765_s6 + $0x18] sm:$0xff]   ;;  %v4811_v35 = vld [vmem:[%s4765_s6 + $0xa8] sm:$0xff]   ;;  %v4435_v53 = vld [vmem:[%s6151_s1 + $0xb0] sm:$0xff]  }
  0x1e   : > { %3785 = vmatpush3.bf16.msra.mxu0 %v4411_v5  ;;  %4342 = vmatpush3.bf16.msra.mxu1 %v4411_v5  ;;  %v927_v20 = vrot.slane %v925_v15, 1  ;;  %v932_v21 = vrot.slane %v930_v16, 1  ;;  %v4808_v34 = vld [vmem:[%s4765_s6 + $0x20] ss:$0 sps:$4 sm:$0x11]   ;;  %v935_v37 = vshrl.u32 %v4801_v30, 16 }
  0x1f   : > { %3786 = vmatprep.subr.bf16.mxu0 %v4412_v6  ;;  %4335 = vmatprep.subr.bf16.mxu1 %v4412_v6  ;;  %v1071_v28 = vrot.slane %v1069_v23, 1  ;;  %v1076_v29 = vrot.slane %v1074_v25, 1  ;;  %v937_v38 = vshll.u32 %v4801_v30, 16  ;;  %v942_v40 = vshll.u32 %v4808_v34, 16  ;;  %v4836_v54 = vld [vmem:[%s4765_s6 + $0x24] sm:$0xff]   ;;  %v4849_v61 = vld [vmem:[%s4765_s6 + $0xb4] sm:$0xff]  }
  0x20   : > { %v928_v27 = vor.u32 %v927_v20, %v923_v14  ;;  %v4821_v41 = vld [vmem:[%s4765_s6 + $0xb0] ss:$0 sps:$4 sm:$0x11]   ;;  %v1079_v42 = vshrl.u32 %v4811_v35, 16  ;;  %v1081_v43 = vshll.u32 %v4811_v35, 16  ;;  %v947_v58 = vshrl.u32 %v4836_v54, 16 }
  0x21   : > { %v1072_v33 = vor.u32 %v1071_v28, %v1067_v22  ;;  %v939_v45 = vrot.slane %v937_v38, 1  ;;  %v944_v46 = vrot.slane %v942_v40, 1  ;;  %v1086_v48 = vshll.u32 %v4821_v41, 16  ;;  %v4839_v55 = vld [vmem:[%s4765_s6 + $0x2c] ss:$0 sps:$4 sm:$0x11]  }
  0x22   : > { %3787 = vmatpush3.bf16.msra.mxu0 %v4413_v7  ;;  %4343 = vmatpush3.bf16.msra.mxu1 %v4413_v7  ;;  %v933_v32 = vsel %vm407_vm0, %v928_v27, %v932_v21  ;;  %v1083_v47 = vrot.slane %v1081_v43, 1  ;;  %v949_v59 = vshll.u32 %v4836_v54, 16  ;;  %v954_v60 = vshll.u32 %v4839_v55, 16  ;;  %v4855_v63 = vld [vmem:[%s4765_s6 + $0xbc] ss:$0 sps:$4 sm:$0x11]  }
  0x23   : > { %3788 = vmatprep.subr.bf16.mxu0 %v4414_v8  ;;  %4336 = vmatprep.subr.bf16.mxu1 %v4414_v8  ;;  %v1077_v39 = vsel %vm407_vm0, %v1072_v33, %v1076_v29  ;;  %v940_v50 = vor.u32 %v939_v45, %v935_v37  ;;  %v1088_v52 = vrot.slane %v1086_v48, 1  ;;  %v1091_v2 = vshrl.u32 %v4849_v61, 16  ;;  %v4434_v5 = vld [vmem:[%s6151_s1 + $0x160] sm:$0xff]   ;;  %v4864_v8 = vld [vmem:[%s4765_s6 + $0x30] sm:$0xff]   ;;  %v4440_v23 = vld [vmem:[%s6151_s1 + $0x158] sm:$0xff]  }
  0x24   : > { %1419 = vmatprep.mubr.bf16.mxu0 %v933_v32  ;;  %1515 = vmatprep.mubr.bf16.mxu1 %v1077_v39  ;;  %v1084_v51 = vor.u32 %v1083_v47, %v1079_v42  ;;  %v951_v0 = vrot.slane %v949_v59, 1  ;;  %v956_v1 = vrot.slane %v954_v60, 1  ;;  %v1093_v3 = vshll.u32 %v4849_v61, 16  ;;  %v4874_v20 = vld [vmem:[%s4765_s6 + $0xc0] sm:$0xff]   ;;  %v4447_v25 = vld [vmem:[%s6151_s1 + $0xa8] sm:$0xff]   ;;  %v4441_v40 = vld [vmem:[%s6151_s1 + $0x150] sm:$0xff]  }
  0x25   : > { %v945_v56 = vsel %vm407_vm0, %v940_v50, %v944_v46  ;;  %v1098_v4 = vshll.u32 %v4855_v63, 16  ;;  %v959_v15 = vshrl.u32 %v4864_v8, 16  ;;  %v961_v16 = vshll.u32 %v4864_v8, 16  ;;  %v4877_v21 = vld [vmem:[%s4765_s6 + $0xc8] ss:$0 sps:$4 sm:$0x11]  }
  0x26   : > { %3789 = vmatpush3.bf16.msra.mxu0 %v4415_v9  ;;  %4344 = vmatpush3.bf16.msra.mxu1 %v4415_v9  ;;  %v1089_v57 = vsel %vm407_vm0, %v1084_v51, %v1088_v52  ;;  %v952_v6 = vor.u32 %v951_v0, %v947_v58  ;;  %v1095_v7 = vrot.slane %v1093_v3, 1  ;;  %v1103_v27 = vshrl.u32 %v4874_v20, 16  ;;  %v4895_v38 = vld [vmem:[%s4765_s6 + $0x44] ss:$0 sps:$4 sm:$0x11]   ;;  %v4446_v47 = vld [vmem:[%s6151_s1 + $0x148] sm:$0xff]  }
  0x27   : > { %3790 = vmatprep.subr.bf16.mxu0 %v4416_v10  ;;  %4337 = vmatprep.subr.bf16.mxu1 %v4416_v10  ;;  %v1100_v9 = vrot.slane %v1098_v4, 1  ;;  %v4867_v10 = vld [vmem:[%s4765_s6 + $0x38] ss:$0 sps:$4 sm:$0x11]   ;;  %v1105_v28 = vshll.u32 %v4874_v20, 16  ;;  %v1110_v29 = vshll.u32 %v4877_v21, 16 }
  0x28   : > { %v1096_v14 = vor.u32 %v1095_v7, %v1091_v2  ;;  %v978_v46 = vshll.u32 %v4895_v38, 16  ;;  %v4914_v51 = vld [vmem:[%s4765_s6 + $0x48] sm:$0xff]   ;;  %v4917_v52 = vld [vmem:[%s4765_s6 + $0x50] ss:$0 sps:$4 sm:$0x11]   ;;  %v1133_v0 = vrot.slane %v4801_v30, 1 }
  0x29   : > { %v1107_v32 = vrot.slane %v1105_v28, 1  ;;  %v1112_v33 = vrot.slane %v1110_v29, 1  ;;  %v983_v58 = vshrl.u32 %v4914_v51, 16  ;;  %v985_v59 = vshll.u32 %v4914_v51, 16  ;;  %v4451_v3 = vld [vmem:[%s6151_s1 + $0x78] sm:$0xff]   ;;  %v4467_v29 = vld [vmem:[%s6151_s1 + $0x90] sm:$0xff]  }
  0x2a   : > { %3791 = vmatpush3.bf16.msra.mxu0 %v4417_v11  ;;  %4345 = vmatpush3.bf16.msra.mxu1 %v4417_v11  ;;  %v957_v11 = vsel %vm407_vm0, %v952_v6, %v956_v1  ;;  %v1101_v22 = vsel %vm407_vm0, %v1096_v14, %v1100_v9  ;;  %v980_v48 = vrot.slane %v978_v46, 1  ;;  %v4931_v1 = vld [vmem:[%s4765_s6 + $0x54] sm:$0xff]   ;;  %v1134_v2 = vrot.slane %v4808_v34, 1  ;;  %v4940_v4 = vld [vmem:[%s4765_s6 + $0x5c] ss:$0 sps:$4 sm:$0x11]  }
  0x2b   : > { %3792 = vmatprep.subr.bf16.mxu0 %v4418_v18  ;;  %4338 = vmatprep.subr.bf16.mxu1 %v4418_v18  ;;  %v966_v18 = vshll.u32 %v4867_v10, 16  ;;  %v1108_v37 = vor.u32 %v1107_v32, %v1103_v27  ;;  %v997_v7 = vshll.u32 %v4931_v1, 16  ;;  %v1136_v34 = vrot.slane %v4836_v54, 1  ;;  %v4452_v14 = vld [vmem:[%s6151_s1 + $0x38] sm:$0xff]   ;;  %v4461_v27 = vld [vmem:[%s6151_s1 + $0x68] sm:$0xff]  }
  0x2c   : > { %v1137_v9 = vrot.slane %v4839_v55, 1  ;;  %v1002_v55 = vshll.u32 %v4940_v4, 16  ;;  %v4977_v32 = vld [vmem:[%s4765_s6 + $0x68] ss:$0 sps:$4 sm:$0x11]   ;;  %v1146_v46 = vrot.slane %v4917_v52, 1 }
  0x2e   : > { %3793 = vmatpush3.bf16.msra.mxu0 %v4419_v24  ;;  %4346 = vmatpush3.bf16.msra.mxu1 %v4419_v24  ;;  %v963_v24 = vrot.slane %v961_v16, 1  ;;  %v1140_v16 = vrot.slane %v4867_v10, 1  ;;  %v1004_v28 = vrot.slane %v1002_v55, 1  ;;  %v4483_v55 = vld [vmem:[%s6151_s1 + $0x80] sm:$0xff]  }
  0x2f   : > { %3794 = vmatprep.subr.bf16.mxu0 %v4420_v26  ;;  %4339 = vmatprep.subr.bf16.mxu1 %v4420_v26  ;;  %v968_v26 = vrot.slane %v966_v18, 1  ;;  %v4456_v18 = vld [vmem:[%s6151_s1 + $0x70] sm:$0xff]  }
  0x32   : > { %3795 = vmatpush3.bf16.msra.mxu0 %v4421_v31  ;;  %4347 = vmatpush3.bf16.msra.mxu1 %v4421_v31  ;;  %v964_v31 = vor.u32 %v963_v24, %v959_v15  ;;  %v1139_v15 = vrot.slane %v4864_v8, 1  ;;  %v4961_v24 = vld [vmem:[%s4765_s6 + $0x60] sm:$0xff]  }
  0x33   : > { %4188 = vmatprep.subr.bf16.mxu1 %v4426_v36  ;;  %4236 = vmatprep.subr.bf16.mxu0 %v4427_v44 }
  0x34   : > { %v969_v42 = vsel %vm407_vm0, %v964_v31, %v968_v26  ;;  %v1143_v26 = vrot.slane %v4895_v38, 1  ;;  %v1145_v38 = vrot.slane %v4914_v51, 1 }
  0x35   : > { %1420 = vmatmul.mubr.bf16.vlgmr.msra.gmra.mxu0 %v4774_v12  ;;  %1516 = vmatmul.mubr.bf16.vlgmr.msra.gmra.mxu1 %v4783_v17 }
  0x36   : > { %4189 = vmatpush3.bf16.msra.mxu1 %v4426_v36  ;;  %4237 = vmatpush3.bf16.msra.mxu0 %v4427_v44  ;;  %v4892_v36 = vld [vmem:[%s4765_s6 + $0x3c] sm:$0xff]   ;;  %v1113_v44 = vsel %vm407_vm0, %v1108_v37, %v1112_v33  ;;  %v1009_v33 = vshll.u32 %v4961_v24, 16 }
  0x37   : > { %4190 = vmatprep.subr.bf16.mxu1 %v4428_v49  ;;  %1427 = vmatprep.mubr.bf16.mxu0 %v945_v56  ;;  %v973_v39 = vshll.u32 %v4892_v36, 16  ;;  %v971_v43 = vshrl.u32 %v4892_v36, 16  ;;  %v1131_v56 = vrot.slane %v4777_v13, 1  ;;  %v1142_v10 = vrot.slane %v4892_v36, 1 }
  0x38   : > { %1523 = vmatprep.mubr.bf16.mxu1 %v1089_v57  ;;  %4238 = vmatprep.subr.bf16.mxu0 %v4435_v53  ;;  %v4448_v57 = vld [vmem:[%s6151_s1 + $0x140] sm:$0xff]  }
  0x39   : > { %v975_v45 = vrot.slane %v973_v39, 1  ;;  %v1144_v37 = vsel %vm616_vm1, %v1142_v10, %v1143_v26  ;;  %v4462_v39 = vld [vmem:[%s6151_s1 + $0x28] sm:$0xff]   ;;  %v1176_v10 = vrot.slane %v4877_v21, 1  ;;  %v4484_v21 = vld [vmem:[%s6151_s1 + $0x40] sm:$0xff]  }
  0x3a   : > { %4191 = vmatpush3.bf16.msra.mxu1 %v4428_v49  ;;  %4239 = vmatpush3.bf16.msra.mxu0 %v4435_v53  ;;  %v4453_v49 = vld [vmem:[%s6151_s1 + $0xa0] sm:$0xff]   ;;  %v1130_v53 = vrot.slane %v4774_v12, 1  ;;  %v990_v12 = vshll.u32 %v4917_v52, 16 }
  0x3b   : > { %4192 = vmatprep.subr.bf16.mxu1 %v4433_v62  ;;  %4240 = vmatprep.subr.bf16.mxu0 %v4447_v25  ;;  %v976_v50 = vor.u32 %v975_v45, %v971_v43  ;;  %v1011_v43 = vrot.slane %v1009_v33, 1  ;;  %v4990_v45 = vld [vmem:[%s4765_s6 + $0x6c] sm:$0xff]  }
  0x3c   : > { %v1132_v13 = vsel %vm616_vm1, %v1130_v53, %v1131_v56  ;;  %v992_v6 = vrot.slane %v990_v12, 1  ;;  %v4469_v53 = vld [vmem:[%s4765_s6 + $0x74] ss:$0 sps:$4 sm:$0x11]   ;;  %v1147_v12 = vsel %vm616_vm1, %v1145_v38, %v1146_v46  ;;  %v5084_v46 = vld [vmem:[%s6151_s1 + $0x238] sm:$0xff]  }
  0x3d   : > { %1428 = vmatmul.mubr.bf16.gmra.mxu0 %v4801_v30  ;;  %1524 = vmatmul.mubr.bf16.gmra.mxu1 %v4811_v35  ;;  %v981_v60 = vsel %vm407_vm0, %v976_v50, %v980_v48  ;;  %v4460_v30 = vld [vmem:[%s6151_s1 + $0x98] sm:$0xff]   ;;  %v1148_v48 = vrot.slane %v4931_v1, 1  ;;  %v4466_v50 = vld [vmem:[%s6151_s1 + $0x20] sm:$0xff]  }
  0x3e   : > { %4193 = vmatpush3.bf16.msra.mxu1 %v4433_v62  ;;  %1435 = vmatprep.mubr.bf16.mxu0 %v957_v11  ;;  %v987_v62 = vrot.slane %v985_v59, 1  ;;  %v1135_v11 = vsel %vm616_vm1, %v1133_v0, %v1134_v2  ;;  %v1151_v59 = vrot.slane %v4961_v24, 1  ;;  %v1154_v0 = vrot.slane %v4990_v45, 1 }
  0x3f   : > { %4194 = vmatprep.subr.bf16.mxu1 %v4434_v5  ;;  %1531 = vmatprep.mubr.bf16.mxu1 %v1101_v22 }
  0x40   : > { %4241 = vmatpush3.bf16.msra.mxu0 %v4447_v25  ;;  %v1138_v25 = vsel %vm616_vm1, %v1136_v34, %v1137_v9  ;;  %v1167_v34 = vrot.slane %v4789_v19, 1  ;;  %v1169_v9 = vrot.slane %v4811_v35, 1 }
  0x41   : > { %4242 = vmatprep.subr.bf16.mxu0 %v4453_v49 }
  0x42   : > { %4195 = vmatpush3.bf16.msra.mxu1 %v4434_v5  ;;  %v988_v5 = vor.u32 %v987_v62, %v983_v58  ;;  %v4478_v58 = vld [vmem:[%s6151_s1 + $0x88] sm:$0xff]   ;;  %v1019_v62 = vshrl.u32 %v4990_v45, 16 }
  0x43   : > { %4196 = vmatprep.subr.bf16.mxu1 %v4440_v23 }
  0x44   : > { %4243 = vmatpush3.bf16.msra.mxu0 %v4453_v49  ;;  %v993_v22 = vsel %vm407_vm0, %v988_v5, %v992_v6  ;;  %v1149_v49 = vrot.slane %v4940_v4, 1  ;;  %v5021_v5 = vld [vmem:[%s4765_s6 + $0x78] sm:$0xff]   ;;  %v4479_v6 = vld [vmem:[%s6151_s1 + $0x50] sm:$0xff]  }
  0x45   : > { %1436 = vmatmul.mubr.bf16.gmra.mxu0 %v4836_v54  ;;  %1532 = vmatmul.mubr.bf16.gmra.mxu1 %v4849_v61  ;;  %v995_v54 = vshrl.u32 %v4931_v1, 16  ;;  %v1157_v33 = vrot.slane %v5021_v5, 1 }
  0x46   : > { %4197 = vmatpush3.bf16.msra.mxu1 %v4440_v23  ;;  %1443 = vmatprep.mubr.bf16.mxu0 %v969_v42  ;;  %v999_v23 = vrot.slane %v997_v7, 1  ;;  %v1007_v42 = vshrl.u32 %v4961_v24, 16  ;;  %v1166_v7 = vrot.slane %v4783_v17, 1  ;;  %v4480_v17 = vld [vmem:[%s6151_s1 + $0x10] sm:$0xff]  }
  0x47   : > { %4198 = vmatprep.subr.bf16.mxu1 %v4441_v40  ;;  %1539 = vmatprep.mubr.bf16.mxu1 %v1113_v44  ;;  %v1014_v44 = vshll.u32 %v4977_v32, 16 }
  0x48   : > { %4244 = vmatprep.subr.bf16.mxu0 %v4460_v30  ;;  %v1000_v31 = vor.u32 %v999_v23, %v995_v54  ;;  %v1012_v52 = vor.u32 %v1011_v43, %v1007_v42  ;;  %v5037_v19 = vsel %vm616_vm1, %v1166_v7, %v1167_v34  ;;  %v4481_v54 = vld [vmem:[%s6151_s1 + $0x48] sm:$0xff]   ;;  %v1172_v23 = vrot.slane %v4849_v61, 1  ;;  %v4485_v43 = vld [vmem:[%s6151_s1] sm:$0xff]  }
  0x49   : > { %4245 = vmatpush3.bf16.msra.mxu0 %v4460_v30  ;;  %v1016_v56 = vrot.slane %v1014_v44, 1  ;;  %v4473_v30 = vld [vmem:[%s6151_s1 + $0x18] sm:$0xff]  }
  0x4a   : > { %4199 = vmatpush3.bf16.msra.mxu1 %v4441_v40  ;;  %4246 = vmatprep.subr.bf16.mxu0 %v4467_v29  ;;  %v1005_v40 = vsel %vm407_vm0, %v1000_v31, %v1004_v28  ;;  %v5057_v31 = vld [vmem:[%s4765_s6 + $0x84] sm:$0xff]   ;;  %v4477_v44 = vld [vmem:[%s4765_s6 + $0x98] ss:$0 sps:$4 sm:$0x11]  }
  0x4b   : > { %4200 = vmatprep.subr.bf16.mxu1 %v4446_v47  ;;  %v1017_v2 = vsel %vm407_vm0, %v1012_v52, %v1016_v56  ;;  %v1045_v42 = vshll.u32 %v5057_v31, 16 }
  0x4d   : > { %1444 = vmatmul.mubr.bf16.gmra.mxu0 %v4864_v8  ;;  %1540 = vmatmul.mubr.bf16.gmra.mxu1 %v4874_v20  ;;  %v4457_v8 = vld [vmem:[%s6151_s1 + $0x30] sm:$0xff]   ;;  %v1047_v52 = vrot.slane %v1045_v42, 1 }
  0x4e   : > { %4201 = vmatpush3.bf16.msra.mxu1 %v4446_v47  ;;  %1451 = vmatprep.mubr.bf16.mxu0 %v981_v60  ;;  %v4465_v47 = vld [vmem:[%s6151_s1 + $0x60] sm:$0xff]   ;;  %v1152_v60 = vrot.slane %v4977_v32, 1  ;;  %v4482_v32 = vld [vmem:[%s6151_s1 + $0x8] sm:$0xff]   ;;  %v4505_v42 = vld [vmem:[%s6151_s1 + $0x230] sm:$0xff]  }
  0x4f   : > { %4202 = vmatprep.subr.bf16.mxu1 %v4448_v57  ;;  %4204 = vmatprep.mubr.bf16.mxu1 %v1132_v13  ;;  %v1026_v13 = vshll.u32 %v4469_v53, 16 }
  0x50   : > { %4247 = vmatpush3.bf16.msra.mxu0 %v4467_v29  ;;  %v1153_v26 = vsel %vm616_vm1, %v1151_v59, %v1152_v60 }
  0x51   : > { %4248 = vmatprep.subr.bf16.mxu0 %v4478_v58 }
  0x52   : > { %4203 = vmatpush3.bf16.msra.mxu1 %v4448_v57  ;;  %v1021_v57 = vshll.u32 %v4990_v45, 16 }
  0x53   : > { %3916 = vmatprep.subr.bf16.mxu1 %v4451_v3  ;;  %v1150_v3 = vsel %vm616_vm1, %v1148_v48, %v1149_v49  ;;  %v4476_v48 = vld [vmem:[%s4765_s6 + $0x90] sm:$0xff]   ;;  %v1043_v49 = vshrl.u32 %v5057_v31, 16 }
  0x54   : > { %v1023_v4 = vrot.slane %v1021_v57, 1  ;;  %4249 = vmatpush3.bf16.msra.mxu0 %v4478_v58  ;;  %v1163_v57 = vrot.slane %v4476_v48, 1  ;;  %v1057_v60 = vshll.u32 %v4476_v48, 16 }
  0x55   : > { %1452 = vmatmul.mubr.bf16.gmra.mxu0 %v4892_v36  ;;  %4205 = vmatmul.mubr.bf16.vlgmr.msra.gmra.mxu1 %v1135_v11  ;;  %v1141_v36 = vsel %vm616_vm1, %v1139_v15, %v1140_v16  ;;  %v1170_v11 = vrot.slane %v4821_v41, 1  ;;  %v1155_v15 = vrot.slane %v4469_v53, 1  ;;  %v4471_v16 = vld [vmem:[%s4765_s6 + $0x80] ss:$0 sps:$4 sm:$0x11]   ;;  %v1031_v41 = vshrl.u32 %v5021_v5, 16 }
  0x56   : > { %3917 = vmatpush3.bf16.msra.mxu1 %v4452_v14  ;;  %1459 = vmatprep.mubr.bf16.mxu0 %v993_v22  ;;  %v1028_v14 = vrot.slane %v1026_v13, 1  ;;  %v4475_v22 = vld [vmem:[%s4765_s6 + $0x8c] ss:$0 sps:$4 sm:$0x11]   ;;  %v1038_v29 = vshll.u32 %v4471_v16, 16  ;;  %v1048_v58 = vor.u32 %v1047_v52, %v1043_v49  ;;  %v5150_v52 = vld [vmem:[%s4765_s6 + $0x3c] sm:$0xff]  }
  0x57   : > { %4208 = vmatprep.mubr.bf16.mxu1 %v1138_v25  ;;  %3918 = vmatprep.subr.bf16.mxu1 %v4456_v18  ;;  %v1033_v18 = vshll.u32 %v5021_v5, 16  ;;  %v5040_v35 = vsel %vm616_vm1, %v1169_v9, %v1170_v11  ;;  %v1173_v25 = vrot.slane %v4855_v63, 1  ;;  %v1050_v56 = vshll.u32 %v4475_v22, 16 }
  0x58   : > { %4250 = vmatprep.subr.bf16.mxu0 %v4483_v55 }
  0x59   : > { %v1035_v28 = vrot.slane %v1033_v18, 1  ;;  %4251 = vmatpush3.bf16.msra.mxu0 %v4483_v55  ;;  %v1174_v63 = vsel %vm616_vm1, %v1172_v23, %v1173_v25  ;;  %v1052_v59 = vrot.slane %v1050_v56, 1  ;;  %v4503_v56 = vld [vmem:[%s6151_s1 + $0x1e8] sm:$0xff]  }
  0x5a   : > { %3919 = vmatpush3.bf16.msra.mxu1 %v4457_v8  ;;  %v1175_v8 = vrot.slane %v4874_v20, 1 }
  0x5b   : > { %3920 = vmatprep.subr.bf16.mxu1 %v4461_v27  ;;  %v1156_v27 = vsel %vm616_vm1, %v1154_v0, %v1155_v15  ;;  %v1036_v38 = vor.u32 %v1035_v28, %v1031_v41  ;;  %v1053_v13 = vsel %vm407_vm0, %v1048_v58, %v1052_v59  ;;  %v1055_v0 = vshrl.u32 %v4476_v48, 16  ;;  %v4489_v15 = vld [vmem:[%s4765_s6 + $0x14] ss:$0 sps:$4 sm:$0x11]   ;;  %v5108_v41 = vld [vmem:[%s4765_s6 + $0x18] sm:$0xff]   ;;  %v5163_v59 = vld [vmem:[%s4765_s6 + $0x48] sm:$0xff]  }
  0x5c   : > { %v5065_v20 = vsel %vm616_vm1, %v1175_v8, %v1176_v10  ;;  %v621_v8 = vrot.slane %v4489_v15, 1  ;;  %v4491_v28 = vld [vmem:[%s6151_s1 + $0x1b8] sm:$0xff]   ;;  %v5160_v58 = vld [vmem:[%s4765_s6 + $0x44] ss:$0 sps:$4 sm:$0x11]  }
  0x5d   : > { %1460 = vmatmul.mubr.bf16.gmra.mxu0 %v4914_v51  ;;  %4209 = vmatmul.mubr.bf16.gmra.mxu1 %v1141_v36  ;;  %v4472_v51 = vld [vmem:[%s6151_s1 + $0x58] sm:$0xff]   ;;  %v1158_v36 = vrot.slane %v4471_v16, 1 }
  0x5e   : > { %1467 = vmatprep.mubr.bf16.mxu0 %v1005_v40  ;;  %4212 = vmatprep.mubr.bf16.mxu1 %v1144_v37  ;;  %v1040_v37 = vrot.slane %v1038_v29, 1  ;;  %v1161_v40 = vrot.slane %v4475_v22, 1 }
  0x5f   : > { %3921 = vmatpush3.bf16.msra.mxu1 %v4462_v39  ;;  %v1160_v39 = vrot.slane %v5057_v31, 1 }
  0x60   : > { %3922 = vmatprep.subr.bf16.mxu1 %v4465_v47  ;;  %v1159_v47 = vsel %vm616_vm1, %v1157_v33, %v1158_v36  ;;  %v5128_v36 = vld [vmem:[%s4765_s6 + $0x30] sm:$0xff]  }
  0x61   : > { %v1162_v53 = vsel %vm616_vm1, %v1160_v39, %v1161_v40  ;;  %v4497_v40 = vld [vmem:[%s6151_s1 + $0x1f0] sm:$0xff]   ;;  %v629_v49 = vrot.slane %v5128_v36, 1 }
  0x63   : > { %3923 = vmatpush3.bf16.msra.mxu1 %v4466_v50  ;;  %v1041_v50 = vsel %vm407_vm0, %v1036_v38, %v1040_v37  ;;  %v5131_v37 = vld [vmem:[%s4765_s6 + $0x38] ss:$0 sps:$4 sm:$0x11]  }
  0x64   : > { %3924 = vmatprep.subr.bf16.mxu1 %v4472_v51  ;;  %v1164_v51 = vrot.slane %v4477_v44, 1 }
  0x65   : > { %1468 = vmatmul.mubr.bf16.gmra.mxu0 %v4931_v1  ;;  %4213 = vmatmul.mubr.bf16.gmra.mxu1 %v1147_v12  ;;  %v1024_v1 = vor.u32 %v1023_v4, %v1019_v62  ;;  %v4486_v12 = vld [vmem:[%s4765_s6] sm:$0xff]  }
  0x66   : > { %1475 = vmatprep.mubr.bf16.mxu0 %v1017_v2  ;;  %4216 = vmatprep.mubr.bf16.mxu1 %v1150_v3  ;;  %v1165_v62 = vsel %vm616_vm1, %v1163_v57, %v1164_v51  ;;  %v1059_v2 = vrot.slane %v1057_v60, 1  ;;  %v1062_v3 = vshll.u32 %v4477_v44, 16  ;;  %v411_v4 = vshll.u32 %v4486_v12, 16  ;;  %v4498_v44 = vld [vmem:[%s6151_s1 + $0x1b0] sm:$0xff]  }
  0x67   : > { %3925 = vmatpush3.bf16.msra.mxu1 %v4473_v30  ;;  %v1029_v61 = vsel %vm407_vm0, %v1024_v1, %v1028_v14  ;;  %v409_v7 = vshrl.u32 %v4486_v12, 16  ;;  %v617_v14 = vrot.slane %v4486_v12, 1  ;;  %v428_v1 = vshll.u32 %v4489_v15, 16  ;;  %v5166_v60 = vld [vmem:[%s4765_s6 + $0x50] ss:$0 sps:$4 sm:$0x11]  }
  0x68   : > { %3926 = vmatprep.subr.bf16.mxu1 %v4479_v6  ;;  %v1060_v30 = vor.u32 %v1059_v2, %v1055_v0  ;;  %v1064_v6 = vrot.slane %v1062_v3, 1  ;;  %v413_v34 = vrot.slane %v411_v4, 1  ;;  %v4504_v0 = vld [vmem:[%s6151_s1 + $0x1a8] sm:$0xff]   ;;  %v4510_v3 = vld [vmem:[%s6151_s1 + $0x1e0] sm:$0xff]   ;;  %v632_v4 = vrot.slane %v5150_v52, 1 }
  0x69   : > { %v430_v10 = vrot.slane %v428_v1, 1  ;;  %v5193_v15 = vld [vmem:[%s4765_s6 + $0x68] ss:$0 sps:$4 sm:$0x11]   ;;  %v464_v1 = vshll.u32 %v5131_v37, 16 }
  0x6a   : > { %v1065_v11 = vsel %vm407_vm0, %v1060_v30, %v1064_v6  ;;  %v414_v16 = vor.u32 %v413_v34, %v409_v7  ;;  %v633_v30 = vrot.slane %v5160_v58, 1  ;;  %v635_v7 = vrot.slane %v5163_v59, 1 }
  0x6b   : > { %3927 = vmatpush3.bf16.msra.mxu1 %v4480_v17  ;;  %v636_v34 = vrot.slane %v5166_v60, 1 }
  0x6c   : > { %3928 = vmatprep.subr.bf16.mxu1 %v4481_v54 }
  0x6d   : > { %1476 = vmatmul.mubr.bf16.gmra.mxu0 %v4961_v24  ;;  %4217 = vmatmul.mubr.bf16.gmra.mxu1 %v1153_v26  ;;  %v4490_v24 = vld [vmem:[%s6151_s1 + $0x1f8] sm:$0xff]   ;;  %v623_v26 = vrot.slane %v5108_v41, 1 }
  0x6e   : > { %1483 = vmatprep.mubr.bf16.mxu0 %v1029_v61  ;;  %4220 = vmatprep.mubr.bf16.mxu1 %v1156_v27  ;;  %v435_v27 = vshll.u32 %v5108_v41, 16  ;;  %v4496_v61 = vld [vmem:[%s4765_s6 + $0x2c] ss:$0 sps:$4 sm:$0x11]  }
  0x6f   : > { %3929 = vmatpush3.bf16.msra.mxu1 %v4482_v32  ;;  %4052 = vmatprep.subr.bf16.mxu0 %v4490_v24  ;;  %v5122_v32 = vld [vmem:[%s4765_s6 + $0x24] sm:$0xff]   ;;  %v627_v24 = vrot.slane %v4496_v61, 1  ;;  %v452_v51 = vshll.u32 %v4496_v61, 16  ;;  %v4524_v61 = vld [vmem:[%s6151_s1 + $0x190] sm:$0xff]  }
  0x70   : > { %3930 = vmatprep.subr.bf16.mxu1 %v4484_v21  ;;  %v437_v21 = vrot.slane %v435_v27, 1  ;;  %v447_v57 = vshll.u32 %v5122_v32, 16  ;;  %v466_v27 = vrot.slane %v464_v1, 1 }
  0x71   : > { %v454_v6 = vrot.slane %v452_v51, 1 }
  0x72   : > { %v449_v2 = vrot.slane %v447_v57, 1 }
  0x73   : > { %3931 = vmatpush3.bf16.msra.mxu1 %v4485_v43  ;;  %v626_v43 = vrot.slane %v5122_v32, 1 }
  0x74   : > { %4284 = vmatprep.subr.bf16.mxu1 %v5084_v46 }
  0x75   : > { %1484 = vmatmul.mubr.bf16.gmra.mxu0 %v4990_v45  ;;  %4221 = vmatmul.mubr.bf16.gmra.mxu1 %v1159_v47  ;;  %v4487_v45 = vld [vmem:[%s4765_s6 + $0x8] ss:$0 sps:$4 sm:$0x11]   ;;  %v445_v47 = vshrl.u32 %v5122_v32, 16 }
  0x76   : > { %1491 = vmatprep.mubr.bf16.mxu0 %v1041_v50  ;;  %4224 = vmatprep.mubr.bf16.mxu1 %v1162_v53  ;;  %v416_v9 = vshll.u32 %v4487_v45, 16  ;;  %v618_v17 = vrot.slane %v4487_v45, 1  ;;  %v630_v53 = vrot.slane %v5131_v37, 1  ;;  %v4531_v45 = vld [vmem:[%s6151_s1 + $0x220] sm:$0xff]  }
  0x78   : > { %v418_v18 = vrot.slane %v416_v9, 1  ;;  %v619_v55 = vsel %vm616_vm1, %v617_v14, %v618_v17  ;;  %v450_v9 = vor.u32 %v449_v2, %v445_v47  ;;  %v5190_v14 = vld [vmem:[%s4765_s6 + $0x5c] ss:$0 sps:$4 sm:$0x11]   ;;  %v457_v17 = vshrl.u32 %v5128_v36, 16  ;;  %v4545_v47 = vld [vmem:[%s6151_s1 + $0x210] sm:$0xff]  }
  0x79   : > { %v5275_v2 = vld [vmem:[%s4765_s6 + $0x90] sm:$0xff]  }
  0x7a   : > { %v419_v54 = vsel %vm407_vm0, %v414_v16, %v418_v18  ;;  %v4516_v16 = vld [vmem:[%s6151_s1 + $0x1d8] sm:$0xff]  }
  0x7b   : > { %v5199_v18 = vld [vmem:[%s4765_s6 + $0x54] sm:$0xff]  }
  0x7c   : > { %v493_v1 = vshrl.u32 %v5199_v18, 16 }
  0x7d   : > { %1492 = vmatmul.mubr.bf16.gmra.mxu0 %v5021_v5  ;;  %4225 = vmatmul.mubr.bf16.gmra.mxu1 %v1165_v62  ;;  %v5103_v5 = vld [vmem:[%s4765_s6 + $0xc] sm:$0xff]   ;;  %v628_v62 = vsel %vm616_vm1, %v626_v43, %v627_v24  ;;  %v469_v43 = vshrl.u32 %v5150_v52, 16 }
  0x7e   : > { %1499 = vmatprep.mubr.bf16.mxu0 %v1053_v13  ;;  %4228 = vmatprep.mubr.bf16.mxu1 %v5037_v19  ;;  %v423_v19 = vshll.u32 %v5103_v5, 16  ;;  %v421_v22 = vshrl.u32 %v5103_v5, 16  ;;  %v620_v25 = vrot.slane %v5103_v5, 1  ;;  %v631_v13 = vsel %vm616_vm1, %v629_v49, %v630_v53 }
  0x80   : > { %v425_v23 = vrot.slane %v423_v19, 1  ;;  %v634_v19 = vsel %vm616_vm1, %v632_v4, %v633_v30 }
  0x82   : > { %v426_v29 = vor.u32 %v425_v23, %v421_v22  ;;  %v4517_v23 = vld [vmem:[%s6151_s1 + $0x198] sm:$0xff]  }
  0x84   : > { %v431_v38 = vsel %vm407_vm0, %v426_v29, %v430_v10  ;;  %v4540_v10 = vld [vmem:[%s6151_s1 + $0x218] sm:$0xff]   ;;  %v642_v29 = vrot.slane %v5193_v15, 1 }
  0x85   : > { %1500 = vmatmul.mubr.bf16.gmra.mxu0 %v5057_v31  ;;  %4229 = vmatmul.mubr.bf16.gmra.mxu1 %v5040_v35  ;;  %v4494_v35 = vld [vmem:[%s4765_s6 + $0x20] ss:$0 sps:$4 sm:$0x11]  }
  0x86   : > { %1507 = vmatprep.mubr.bf16.mxu0 %v1065_v11  ;;  %4232 = vmatprep.mubr.bf16.mxu1 %v1174_v63  ;;  %v624_v31 = vrot.slane %v4494_v35, 1  ;;  %v433_v63 = vshrl.u32 %v5108_v41, 16  ;;  %v440_v33 = vshll.u32 %v4494_v35, 16  ;;  %v4511_v11 = vld [vmem:[%s6151_s1 + $0x1a0] sm:$0xff]   ;;  %v637_v35 = vsel %vm616_vm1, %v635_v7, %v636_v34 }
  0x87   : > { %v495_v7 = vshll.u32 %v5199_v18, 16 }
  0x88   : > { %v625_v39 = vsel %vm616_vm1, %v623_v26, %v624_v31  ;;  %v438_v50 = vor.u32 %v437_v21, %v433_v63  ;;  %v639_v26 = vrot.slane %v5190_v14, 1  ;;  %v471_v31 = vshll.u32 %v5150_v52, 16  ;;  %v5228_v63 = vld [vmem:[%s4765_s6 + $0x6c] sm:$0xff]   ;;  %v5234_v21 = vld [vmem:[%s4765_s6 + $0x74] ss:$0 sps:$4 sm:$0x11]  }
  0x89   : > { %v644_v49 = vrot.slane %v5228_v63, 1 }
  0x8a   : > { %v473_v24 = vrot.slane %v471_v31, 1 }
  0x8c   : > { %v474_v51 = vor.u32 %v473_v24, %v469_v43  ;;  %v5328_v43 = vld [vmem:[%s4765_s6 + $0xbc] ss:$0 sps:$4 sm:$0x11]  }
  0x8d   : > { %1508 = vmatmul.mubr.bf16.gmra.mxu0 %v4476_v48  ;;  %4233 = vmatmul.mubr.bf16.gmra.mxu1 %v5065_v20  ;;  %v622_v20 = vsel %vm616_vm1, %v620_v25, %v621_v8  ;;  %v442_v48 = vrot.slane %v440_v33, 1  ;;  %v4523_v25 = vld [vmem:[%s6151_s1 + $0x1d0] sm:$0xff]   ;;  %v638_v8 = vrot.slane %v5199_v18, 1  ;;  %v5237_v33 = vld [vmem:[%s4765_s6 + $0x80] ss:$0 sps:$4 sm:$0x11]  }
  0x8e   : > { %1885 = vmatprep.mubr.bf16.mxu1 %v419_v54  ;;  %4252 = vmatprep.mubr.bf16.mxu0 %v619_v55  ;;  %v5205_v54 = vld [vmem:[%s4765_s6 + $0x60] sm:$0xff]   ;;  %v455_v55 = vsel %vm407_vm0, %v450_v9, %v454_v6  ;;  %v648_v57 = vrot.slane %v5237_v33, 1  ;;  %v5283_v6 = vld [vmem:[%s4765_s6 + $0x98] ss:$0 sps:$4 sm:$0x11]   ;;  %v653_v9 = vrot.slane %v5275_v2, 1 }
  0x8f   : > { %v640_v37 = vsel %vm616_vm1, %v638_v8, %v639_v26  ;;  %v5312_v26 = vld [vmem:[%s4765_s6 + $0x18] sm:$0xff]  }
  0x95   : > { %1886 = vmatmul.mubr.bf16.vlgmr.msra.gmra.mxu1 %v4486_v12  ;;  %4253 = vmatmul.mubr.bf16.vlgmr.msra.gmra.mxu0 %v622_v20  ;;  %v443_v12 = vsel %vm407_vm0, %v438_v50, %v442_v48  ;;  %v4529_v20 = vld [vmem:[%s6151_s1 + $0x1c8] sm:$0xff]   ;;  %v4536_v48 = vld [vmem:[%s6151_s1 + $0x1c0] sm:$0xff]   ;;  %v645_v50 = vrot.slane %v5234_v21, 1 }
  0x96   : > { %4053 = vmatpush3.bf16.msra.mxu0 %v4491_v28  ;;  %4285 = vmatpush3.bf16.msra.mxu1 %v5084_v46  ;;  %v4518_v46 = vld [vmem:[%s6151_s1 + $0x228] sm:$0xff]   ;;  %v641_v28 = vrot.slane %v5205_v54, 1 }
  0x97   : > { %1893 = vmatprep.mubr.bf16.mxu1 %v431_v38  ;;  %4256 = vmatprep.mubr.bf16.mxu0 %v625_v39  ;;  %v476_v38 = vshll.u32 %v5160_v58, 16  ;;  %v5242_v39 = vld [vmem:[%s4765_s6 + $0x78] sm:$0xff]   ;;  %v5266_v58 = vld [vmem:[%s4765_s6 + $0x84] sm:$0xff]  }
  0x98   : > { %4054 = vmatprep.subr.bf16.mxu0 %v4497_v40  ;;  %4286 = vmatprep.subr.bf16.mxu1 %v4505_v42 }
  0x99   : > { %v478_v53 = vrot.slane %v476_v38, 1  ;;  %v2371_v38 = vshll.u32 %v5312_v26, 16 }
  0x9a   : > { %4055 = vmatpush3.bf16.msra.mxu0 %v4498_v44  ;;  %4287 = vmatpush3.bf16.msra.mxu1 %v4505_v42  ;;  %v643_v42 = vsel %vm616_vm1, %v641_v28, %v642_v29  ;;  %v4530_v44 = vld [vmem:[%s6151_s1 + $0x188] sm:$0xff]   ;;  %v505_v29 = vshrl.u32 %v5205_v54, 16 }
  0x9b   : > { %4056 = vmatprep.subr.bf16.mxu0 %v4503_v56  ;;  %4288 = vmatprep.subr.bf16.mxu1 %v4518_v46  ;;  %v647_v56 = vrot.slane %v5242_v39, 1 }
  0x9d   : > { %1894 = vmatmul.mubr.bf16.gmra.mxu1 %v5103_v5  ;;  %4257 = vmatmul.mubr.bf16.gmra.mxu0 %v628_v62  ;;  %v459_v5 = vshll.u32 %v5128_v36, 16  ;;  %v5269_v62 = vld [vmem:[%s4765_s6 + $0x8c] ss:$0 sps:$4 sm:$0x11]   ;;  %v649_v4 = vsel %vm616_vm1, %v647_v56, %v648_v57  ;;  %v2373_v57 = vrot.slane %v2371_v38, 1 }
  0x9e   : > { %1901 = vmatprep.mubr.bf16.mxu1 %v443_v12  ;;  %4260 = vmatprep.mubr.bf16.mxu0 %v631_v13  ;;  %v646_v12 = vsel %vm616_vm1, %v644_v49, %v645_v50  ;;  %v481_v13 = vshrl.u32 %v5163_v59, 16  ;;  %v651_v34 = vrot.slane %v5269_v62, 1  ;;  %v512_v50 = vshll.u32 %v5193_v15, 16 }
  0x9f   : > { %4057 = vmatpush3.bf16.msra.mxu0 %v4504_v0  ;;  %4289 = vmatpush3.bf16.msra.mxu1 %v4518_v46  ;;  %v461_v22 = vrot.slane %v459_v5, 1  ;;  %v483_v46 = vshll.u32 %v5163_v59, 16  ;;  %v488_v0 = vshll.u32 %v5166_v60, 16  ;;  %v650_v60 = vrot.slane %v5266_v58, 1 }
  0xa0   : > { %4058 = vmatprep.subr.bf16.mxu0 %v4510_v3  ;;  %4290 = vmatprep.subr.bf16.mxu1 %v4531_v45  ;;  %v4550_v3 = vld [vmem:[%s6151_s1 + $0x208] sm:$0xff]  }
  0xa1   : > { %v485_v30 = vrot.slane %v483_v46, 1 }
  0xa3   : > { %4059 = vmatpush3.bf16.msra.mxu0 %v4511_v11  ;;  %4291 = vmatpush3.bf16.msra.mxu1 %v4531_v45  ;;  %v479_v45 = vsel %vm407_vm0, %v474_v51, %v478_v53  ;;  %v5291_v11 = vld [vmem:[%s4765_s6 + $0x9c] sm:$0xff]   ;;  %v486_v5 = vor.u32 %v485_v30, %v481_v13  ;;  %v2369_v53 = vshrl.u32 %v5312_v26, 16  ;;  %v2576_v51 = vrot.slane %v5312_v26, 1 }
  0xa4   : > { %4060 = vmatprep.subr.bf16.mxu0 %v4516_v16  ;;  %4292 = vmatprep.subr.bf16.mxu1 %v4540_v10  ;;  %v490_v16 = vrot.slane %v488_v0, 1  ;;  %v663_v13 = vrot.slane %v5328_v43, 1 }
  0xa5   : > { %1902 = vmatmul.mubr.bf16.gmra.mxu1 %v5108_v41  ;;  %4261 = vmatmul.mubr.bf16.gmra.mxu0 %v634_v19  ;;  %v462_v41 = vor.u32 %v461_v22, %v457_v17  ;;  %v654_v17 = vrot.slane %v5283_v6, 1  ;;  %v5298_v19 = vld [vmem:[%s4765_s6 + $0xa4] ss:$0 sps:$4 sm:$0x11]   ;;  %v497_v22 = vrot.slane %v495_v7, 1  ;;  %v2374_v30 = vor.u32 %v2373_v57, %v2369_v53 }
  0xa6   : > { %1909 = vmatprep.mubr.bf16.mxu1 %v455_v55  ;;  %4264 = vmatprep.mubr.bf16.mxu0 %v637_v35  ;;  %v500_v55 = vshll.u32 %v5190_v14, 16  ;;  %v5303_v35 = vld [vmem:[%s4765_s6 + $0xa8] sm:$0xff]   ;;  %v491_v8 = vsel %vm407_vm0, %v486_v5, %v490_v16  ;;  %v656_v14 = vrot.slane %v5291_v11, 1  ;;  %v524_v5 = vshll.u32 %v5234_v21, 16 }
  0xa7   : > { %4061 = vmatpush3.bf16.msra.mxu0 %v4517_v23  ;;  %4293 = vmatpush3.bf16.msra.mxu1 %v4540_v10  ;;  %v467_v40 = vsel %vm407_vm0, %v462_v41, %v466_v27  ;;  %v5306_v23 = vld [vmem:[%s4765_s6 + $0xb0] ss:$0 sps:$4 sm:$0x11]   ;;  %v655_v10 = vsel %vm616_vm1, %v653_v9, %v654_v17  ;;  %v657_v27 = vrot.slane %v5298_v19, 1  ;;  %v498_v41 = vor.u32 %v497_v22, %v493_v1 }
  0xa8   : > { %4062 = vmatprep.subr.bf16.mxu0 %v4523_v25  ;;  %4294 = vmatprep.subr.bf16.mxu1 %v4545_v47  ;;  %v652_v25 = vsel %vm616_vm1, %v650_v60, %v651_v34  ;;  %v502_v28 = vrot.slane %v500_v55, 1  ;;  %v659_v31 = vrot.slane %v5303_v35, 1  ;;  %v517_v9 = vshrl.u32 %v5228_v63, 16  ;;  %v5358_v22 = vld [vmem:[%s4765_s6 + $0x30] sm:$0xff]  }
  0xaa   : > { %v503_v24 = vsel %vm407_vm0, %v498_v41, %v502_v28  ;;  %v2395_v28 = vshll.u32 %v5358_v22, 16 }
  0xab   : > { %4063 = vmatpush3.bf16.msra.mxu0 %v4524_v61  ;;  %4295 = vmatpush3.bf16.msra.mxu1 %v4545_v47  ;;  %v660_v61 = vrot.slane %v5306_v23, 1  ;;  %v5334_v47 = vld [vmem:[%s4765_s6 + $0x24] sm:$0xff]  }
  0xac   : > { %4064 = vmatprep.subr.bf16.mxu0 %v4529_v20  ;;  %4296 = vmatprep.subr.bf16.mxu1 %v4550_v3  ;;  %v507_v20 = vshll.u32 %v5205_v54, 16  ;;  %v2383_v60 = vshll.u32 %v5334_v47, 16  ;;  %v2381_v17 = vshrl.u32 %v5334_v47, 16  ;;  %v2397_v38 = vrot.slane %v2395_v28, 1 }
  0xad   : > { %1910 = vmatmul.mubr.bf16.gmra.mxu1 %v5122_v32  ;;  %4265 = vmatmul.mubr.bf16.gmra.mxu0 %v640_v37  ;;  %v4537_v32 = vld [vmem:[%s6151_s1 + $0x180] sm:$0xff]   ;;  %v572_v28 = vshll.u32 %v5298_v19, 16 }
  0xae   : > { %1917 = vmatprep.mubr.bf16.mxu1 %v467_v40  ;;  %4268 = vmatprep.mubr.bf16.mxu0 %v643_v42  ;;  %v4539_v37 = vld [vmem:[%s4765_s6 + $0x20] ss:$0 sps:$4 sm:$0x11]   ;;  %v4542_v40 = vld [vmem:[%s4765_s6 + $0x2c] ss:$0 sps:$4 sm:$0x11]  }
  0xaf   : > { %4065 = vmatpush3.bf16.msra.mxu0 %v4530_v44  ;;  %4297 = vmatpush3.bf16.msra.mxu1 %v4550_v3  ;;  %v5325_v42 = vld [vmem:[%s4765_s6 + $0xb4] sm:$0xff]   ;;  %v661_v44 = vsel %vm616_vm1, %v659_v31, %v660_v61  ;;  %v509_v49 = vrot.slane %v507_v20, 1  ;;  %v2376_v56 = vshll.u32 %v4539_v37, 16  ;;  %v2577_v46 = vrot.slane %v4539_v37, 1 }
  0xb0   : > { %4066 = vmatprep.subr.bf16.mxu0 %v4536_v48  ;;  %v2580_v48 = vrot.slane %v4542_v40, 1  ;;  %v2385_v1 = vrot.slane %v2383_v60, 1  ;;  %v2388_v55 = vshll.u32 %v4542_v40, 16  ;;  %v536_v31 = vshll.u32 %v5237_v33, 16  ;;  %v5373_v40 = vld [vmem:[%s4765_s6 + $0x3c] sm:$0xff]  }
  0xb1   : > { %v5344_v0 = vsel %vm616_vm1, %v2576_v51, %v2577_v46  ;;  %v510_v3 = vor.u32 %v509_v49, %v505_v29  ;;  %v529_v29 = vshrl.u32 %v5242_v39, 16  ;;  %v5379_v49 = vld [vmem:[%s4765_s6 + $0x44] ss:$0 sps:$4 sm:$0x11]   ;;  %v2405_v51 = vshrl.u32 %v5373_v40, 16 }
  0xb3   : > { %4067 = vmatpush3.bf16.msra.mxu0 %v4537_v32  ;;  %v2579_v32 = vrot.slane %v5334_v47, 1 }
  0xb5   : > { %1918 = vmatmul.mubr.bf16.gmra.mxu1 %v5128_v36  ;;  %4269 = vmatmul.mubr.bf16.gmra.mxu0 %v646_v12  ;;  %v4555_v36 = vld [vmem:[%s6151_s1 + $0x200] sm:$0xff]   ;;  %v662_v12 = vrot.slane %v5325_v42, 1  ;;  %v5347_v15 = vsel %vm616_vm1, %v2579_v32, %v2580_v48  ;;  %v2412_v32 = vshll.u32 %v5379_v49, 16 }
  0xb6   : > { %1925 = vmatprep.mubr.bf16.mxu1 %v479_v45  ;;  %4272 = vmatprep.mubr.bf16.mxu0 %v649_v4  ;;  %v514_v45 = vrot.slane %v512_v50, 1  ;;  %v519_v4 = vshll.u32 %v5228_v63, 16  ;;  %v2407_v50 = vshll.u32 %v5373_v40, 16 }
  0xb7   : > { %4298 = vmatprep.subr.bf16.mxu1 %v4555_v36  ;;  %v664_v7 = vsel %vm616_vm1, %v662_v12, %v663_v13  ;;  %v5389_v12 = vld [vmem:[%s4765_s6 + $0x48] sm:$0xff]  }
  0xb8   : > { %4299 = vmatpush3.bf16.msra.mxu1 %v4555_v36  ;;  %v515_v34 = vsel %vm407_vm0, %v510_v3, %v514_v45  ;;  %v521_v36 = vrot.slane %v519_v4, 1  ;;  %v2409_v46 = vrot.slane %v2407_v50, 1  ;;  %v2414_v4 = vrot.slane %v2412_v32, 1 }
  0xba   : > { %v522_v21 = vor.u32 %v521_v36, %v517_v9  ;;  %v2410_v45 = vor.u32 %v2409_v46, %v2405_v51  ;;  %v2417_v9 = vshrl.u32 %v5389_v12, 16 }
  0xbd   : > { %1926 = vmatmul.mubr.bf16.gmra.mxu1 %v5150_v52  ;;  %4273 = vmatmul.mubr.bf16.gmra.mxu0 %v652_v25  ;;  %v658_v52 = vsel %vm616_vm1, %v656_v14, %v657_v27  ;;  %v526_v25 = vrot.slane %v524_v5, 1  ;;  %v2386_v14 = vor.u32 %v2385_v1, %v2381_v17  ;;  %v2390_v27 = vrot.slane %v2388_v55, 1 }
  0xbe   : > { %1933 = vmatprep.mubr.bf16.mxu1 %v491_v8  ;;  %4276 = vmatprep.mubr.bf16.mxu0 %v655_v10  ;;  %v531_v8 = vshll.u32 %v5242_v39, 16  ;;  %v5363_v10 = vld [vmem:[%s4765_s6 + $0x38] ss:$0 sps:$4 sm:$0x11]  }
  0xbf   : > { %v2400_v61 = vshll.u32 %v5363_v10, 16  ;;  %v527_v20 = vsel %vm407_vm0, %v522_v21, %v526_v25  ;;  %v2391_v37 = vsel %vm407_vm0, %v2386_v14, %v2390_v27  ;;  %v565_v27 = vshrl.u32 %v5291_v11, 16 }
  0xc0   : > { %v533_v41 = vrot.slane %v531_v8, 1  ;;  %v5411_v8 = vld [vmem:[%s4765_s6 + $0x5c] ss:$0 sps:$4 sm:$0x11]  }
  0xc1   : > { %v2402_v48 = vrot.slane %v2400_v61, 1  ;;  %v5421_v61 = vld [vmem:[%s4765_s6 + $0x60] sm:$0xff]  }
  0xc2   : > { %v534_v33 = vor.u32 %v533_v41, %v529_v29  ;;  %v2441_v50 = vshrl.u32 %v5421_v61, 16 }
  0xc5   : > { %1934 = vmatmul.mubr.bf16.gmra.mxu1 %v5163_v59  ;;  %4277 = vmatmul.mubr.bf16.gmra.mxu0 %v658_v52  ;;  %v2378_v59 = vrot.slane %v2376_v56, 1  ;;  %v538_v52 = vrot.slane %v536_v31, 1  ;;  %v541_v56 = vshrl.u32 %v5266_v58, 16 }
  0xc6   : > { %1941 = vmatprep.mubr.bf16.mxu1 %v503_v24  ;;  %4280 = vmatprep.mubr.bf16.mxu0 %v661_v44  ;;  %v543_v24 = vshll.u32 %v5266_v58, 16 }
  0xc7   : > { %v2379_v16 = vsel %vm407_vm0, %v2374_v30, %v2378_v59  ;;  %v539_v53 = vsel %vm407_vm0, %v534_v33, %v538_v52  ;;  %v5395_v30 = vld [vmem:[%s4765_s6 + $0x50] ss:$0 sps:$4 sm:$0x11]   ;;  %v2419_v59 = vshll.u32 %v5389_v12, 16 }
  0xc8   : > { %v2424_v5 = vshll.u32 %v5395_v30, 16  ;;  %v5427_v52 = vld [vmem:[%s4765_s6 + $0x68] ss:$0 sps:$4 sm:$0x11]  }
  0xc9   : > { %v2421_v36 = vrot.slane %v2419_v59, 1  ;;  %v5443_v59 = vld [vmem:[%s4765_s6 + $0x74] ss:$0 sps:$4 sm:$0x11]  }
  0xca   : > { %v2426_v25 = vrot.slane %v2424_v5, 1 }
  0xcb   : > { %v2422_v55 = vor.u32 %v2421_v36, %v2417_v9  ;;  %v589_v9 = vshrl.u32 %v5325_v42, 16  ;;  %v596_v36 = vshll.u32 %v5328_v43, 16 }
  0xcd   : > { %1942 = vmatmul.mubr.bf16.gmra.mxu1 %v5199_v18  ;;  %4281 = vmatmul.mubr.bf16.gmra.mxu0 %v664_v7  ;;  %v2393_v18 = vshrl.u32 %v5358_v22, 16  ;;  %v553_v7 = vshrl.u32 %v5275_v2, 16  ;;  %v2427_v29 = vsel %vm407_vm0, %v2422_v55, %v2426_v25  ;;  %v598_v43 = vrot.slane %v596_v36, 1 }
  0xce   : > { %1949 = vmatprep.mubr.bf16.mxu1 %v515_v34  ;;  %2865 = vmatprep.mubr.bf16.mxu0 %v2379_v16  ;;  %v2415_v34 = vsel %vm407_vm0, %v2410_v45, %v2414_v4  ;;  %v5405_v16 = vld [vmem:[%s4765_s6 + $0x54] sm:$0xff]   ;;  %v591_v4 = vshll.u32 %v5325_v42, 16 }
  0xcf   : > { %v2398_v44 = vor.u32 %v2397_v38, %v2393_v18  ;;  %v2431_v21 = vshll.u32 %v5405_v16, 16  ;;  %v2429_v41 = vshrl.u32 %v5405_v16, 16  ;;  %v2436_v18 = vshll.u32 %v5411_v8, 16 }
  0xd0   : > { %v593_v55 = vrot.slane %v591_v4, 1 }
  0xd1   : > { %v2403_v57 = vsel %vm407_vm0, %v2398_v44, %v2402_v48  ;;  %v2433_v31 = vrot.slane %v2431_v21, 1  ;;  %v2438_v33 = vrot.slane %v2436_v18, 1  ;;  %v577_v44 = vshrl.u32 %v5303_v35, 16 }
  0xd2   : > { %v2460_v21 = vshll.u32 %v5443_v59, 16  ;;  %v594_v18 = vor.u32 %v593_v55, %v589_v9 }
  0xd3   : > { %v2434_v38 = vor.u32 %v2433_v31, %v2429_v41 }
  0xd5   : > { %1950 = vmatmul.mubr.bf16.gmra.mxu1 %v5205_v54  ;;  %2866 = vmatmul.mubr.bf16.vlgmr.msra.gmra.mxu0 %v5312_v26  ;;  %v545_v54 = vrot.slane %v543_v24, 1  ;;  %v548_v26 = vshll.u32 %v5269_v62, 16  ;;  %v555_v62 = vshll.u32 %v5275_v2, 16  ;;  %v2443_v24 = vshll.u32 %v5421_v61, 16 }
  0xd6   : > { %1957 = vmatprep.mubr.bf16.mxu1 %v527_v20  ;;  %2873 = vmatprep.mubr.bf16.mxu0 %v2391_v37  ;;  %v574_v20 = vrot.slane %v572_v28, 1  ;;  %v579_v37 = vshll.u32 %v5303_v35, 16 }
  0xd7   : > { %v546_v13 = vor.u32 %v545_v54, %v541_v56  ;;  %v550_v3 = vrot.slane %v548_v26, 1  ;;  %v2439_v56 = vsel %vm407_vm0, %v2434_v38, %v2438_v33  ;;  %v2445_v54 = vrot.slane %v2443_v24, 1 }
  0xd8   : > { %v581_v48 = vrot.slane %v579_v37, 1  ;;  %v2448_v26 = vshll.u32 %v5427_v52, 16  ;;  %v2462_v37 = vrot.slane %v2460_v21, 1 }
  0xd9   : > { %v551_v60 = vsel %vm407_vm0, %v546_v13, %v550_v3 }
  0xda   : > { %v2450_v45 = vrot.slane %v2448_v26, 1 }
  0xdd   : > { %1958 = vmatmul.mubr.bf16.gmra.mxu1 %v5228_v63  ;;  %2874 = vmatmul.mubr.bf16.gmra.mxu0 %v5334_v47  ;;  %v557_v63 = vrot.slane %v555_v62, 1  ;;  %v560_v47 = vshll.u32 %v5283_v6, 16  ;;  %v567_v6 = vshll.u32 %v5291_v11, 16  ;;  %v2446_v62 = vor.u32 %v2445_v54, %v2441_v50 }
  0xde   : > { %1965 = vmatprep.mubr.bf16.mxu1 %v539_v53  ;;  %2881 = vmatprep.mubr.bf16.mxu0 %v2403_v57  ;;  %v5437_v57 = vld [vmem:[%s4765_s6 + $0x6c] sm:$0xff]  }
  0xdf   : > { %v558_v17 = vor.u32 %v557_v63, %v553_v7  ;;  %v562_v1 = vrot.slane %v560_v47, 1  ;;  %v2453_v5 = vshrl.u32 %v5437_v57, 16 }
  0xe1   : > { %v563_v14 = vsel %vm407_vm0, %v558_v17, %v562_v1 }
  0xe5   : > { %1966 = vmatmul.mubr.bf16.gmra.mxu1 %v5242_v39  ;;  %2882 = vmatmul.mubr.bf16.gmra.mxu0 %v5358_v22  ;;  %v569_v39 = vrot.slane %v567_v6, 1  ;;  %v2451_v6 = vsel %vm407_vm0, %v2446_v62, %v2450_v45 }
  0xe6   : > { %1973 = vmatprep.mubr.bf16.mxu1 %v551_v60  ;;  %2889 = vmatprep.mubr.bf16.mxu0 %v2415_v34  ;;  %v2455_v60 = vshll.u32 %v5437_v57, 16 }
  0xe7   : > { %v570_v19 = vor.u32 %v569_v39, %v565_v27 }
  0xe8   : > { %v2457_v25 = vrot.slane %v2455_v60, 1  ;;  %v5487_v60 = vld [vmem:[%s4765_s6 + $0x8c] ss:$0 sps:$4 sm:$0x11]  }
  0xe9   : > { %v575_v53 = vsel %vm407_vm0, %v570_v19, %v574_v20  ;;  %v5466_v19 = vld [vmem:[%s4765_s6 + $0x80] ss:$0 sps:$4 sm:$0x11]   ;;  %v2484_v55 = vshll.u32 %v5487_v60, 16 }
  0xea   : > { %v2458_v20 = vor.u32 %v2457_v25, %v2453_v5  ;;  %v2472_v26 = vshll.u32 %v5466_v19, 16  ;;  %v5498_v25 = vld [vmem:[%s4765_s6 + $0x90] sm:$0xff]  }
  0xec   : > { %v2474_v4 = vrot.slane %v2472_v26, 1 }
  0xed   : > { %1974 = vmatmul.mubr.bf16.gmra.mxu1 %v5266_v58  ;;  %2890 = vmatmul.mubr.bf16.gmra.mxu0 %v5373_v40  ;;  %v584_v58 = vshll.u32 %v5306_v23, 16  ;;  %v582_v23 = vor.u32 %v581_v48, %v577_v44 }
  0xee   : > { %1981 = vmatprep.mubr.bf16.mxu1 %v563_v14  ;;  %2897 = vmatprep.mubr.bf16.mxu0 %v2427_v29  ;;  %v5457_v14 = vld [vmem:[%s4765_s6 + $0x78] sm:$0xff]  }
  0xef   : > { %v586_v32 = vrot.slane %v584_v58, 1  ;;  %v2467_v38 = vshll.u32 %v5457_v14, 16  ;;  %v2465_v48 = vshrl.u32 %v5457_v14, 16 }
  0xf1   : > { %v587_v34 = vsel %vm407_vm0, %v582_v23, %v586_v32  ;;  %v2469_v54 = vrot.slane %v2467_v38, 1  ;;  %v2583_v38 = vrot.slane %v5363_v10, 1 }
  0xf3   : > { %v2470_v45 = vor.u32 %v2469_v54, %v2465_v48 }
  0xf5   : > { %v3796_v51 = vpop.f32.mrf.mxu0  ;;  %v3868_v46 = vpop.f32.mrf.mxu1  ;;  %1982 = vmatmul.mubr.bf16.gmra.mxu1 %v5275_v2  ;;  %2898 = vmatmul.mubr.bf16.gmra.mxu0 %v5389_v12 }
  0xf6   : > { %1989 = vmatprep.mubr.bf16.mxu1 %v575_v53  ;;  %2905 = vmatprep.mubr.bf16.mxu0 %v2439_v56  ;;  %v599_v53 = vsel %vm407_vm0, %v594_v18, %v598_v43  ;;  %v2463_v56 = vsel %vm407_vm0, %v2458_v20, %v2462_v37  ;;  %v2486_v37 = vrot.slane %v2484_v55, 1  ;;  %v5534_v55 = vld [vmem:[%s4765_s6 + $0xa4] ss:$0 sps:$4 sm:$0x11]  }
  0xf7   : > { %v3797_v13 = vpop.f32.mrf.mxu0  ;;  %v3869_v3 = vpop.f32.mrf.mxu1 }
  0xf8   : > { %v5446_v7 = vadd.f32 %v3797_v13, %v3796_v51  ;;  %v5448_v2 = vadd.f32 %v3869_v3, %v3868_v46  ;;  %v5478_v51 = vld [vmem:[%s4765_s6 + $0x84] sm:$0xff]  }
  0xf9   : > { %v3799_v63 = vpop.f32.mrf.mxu0  ;;  %v3871_v47 = vpop.f32.mrf.mxu1 }
  0xfb   : > { %v3800_v17 = vpop.f32.mrf.mxu0  ;;  %v3872_v1 = vpop.f32.mrf.mxu1 }
  0xfc   : > { %v5459_v27 = vadd.f32 %v3800_v17, %v3799_v63  ;;  %v5461_v39 = vadd.f32 %v3872_v1, %v3871_v47  ;;  %v2479_v63 = vshll.u32 %v5478_v51, 16  ;;  %v2475_v17 = vsel %vm407_vm0, %v2470_v45, %v2474_v4 }
  0xfd   : > { %v3802_v28 = vpop.f32.mrf.mxu0  ;;  %v3874_v29 = vpop.f32.mrf.mxu1  ;;  %1990 = vmatmul.mubr.bf16.gmra.mxu1 %v5291_v11  ;;  %2906 = vmatmul.mubr.bf16.gmra.mxu0 %v5405_v16  ;;  %v2477_v1 = vshrl.u32 %v5478_v51, 16 }
  0xfe   : > { %1997 = vmatprep.mubr.bf16.mxu1 %v587_v34  ;;  %2913 = vmatprep.mubr.bf16.mxu0 %v2451_v6  ;;  %v2481_v6 = vrot.slane %v2479_v63, 1  ;;  %v2585_v63 = vrot.slane %v5373_v40, 1 }
  0xff   : > { %v3803_v41 = vpop.f32.mrf.mxu0  ;;  %v3875_v31 = vpop.f32.mrf.mxu1 }
 0x100   : > { %v5469_v33 = vadd.f32 %v3803_v41, %v3802_v28  ;;  %v5471_v24 = vadd.f32 %v3875_v31, %v3874_v29  ;;  %v2582_v41 = vrot.slane %v5358_v22, 1  ;;  %v2482_v20 = vor.u32 %v2481_v6, %v2477_v1 }
 0x101   : > { %v3805_v11 = vpop.f32.mrf.mxu0  ;;  %v3877_v44 = vpop.f32.mrf.mxu1  ;;  %v2589_v6 = vrot.slane %v5395_v30, 1 }
 0x102   : > { %v2584_v54 = vsel %vm616_vm1, %v2582_v41, %v2583_v38  ;;  %v2508_v38 = vshll.u32 %v5534_v55, 16 }
 0x103   : > { %v3806_v58 = vpop.f32.mrf.mxu0  ;;  %v3878_v50 = vpop.f32.mrf.mxu1 }
 0x104   : > { %v5480_v46 = vadd.f32 %v3806_v58, %v3805_v11  ;;  %v5482_v23 = vadd.f32 %v3878_v50, %v3877_v44  ;;  %v5510_v11 = vld [vmem:[%s4765_s6 + $0x98] ss:$0 sps:$4 sm:$0x11]   ;;  %v2491_v44 = vshll.u32 %v5498_v25, 16 }
 0x105   : > { %v3808_v32 = vpop.f32.mrf.mxu0  ;;  %v3880_v13 = vpop.f32.mrf.mxu1  ;;  %1998 = vmatmul.mubr.bf16.gmra.mxu1 %v5303_v35  ;;  %2914 = vmatmul.mubr.bf16.gmra.mxu0 %v5421_v61  ;;  %v2496_v10 = vshll.u32 %v5510_v11, 16 }
 0x106   : > { %2005 = vmatprep.mubr.bf16.mxu1 %v599_v53  ;;  %2921 = vmatprep.mubr.bf16.mxu0 %v2463_v56  ;;  %v2487_v56 = vsel %vm407_vm0, %v2482_v20, %v2486_v37  ;;  %v2493_v26 = vrot.slane %v2491_v44, 1 }
 0x107   : > { %v3809_v3 = vpop.f32.mrf.mxu0  ;;  %v3881_v62 = vpop.f32.mrf.mxu1  ;;  %v2498_v1 = vrot.slane %v2496_v10, 1 }
 0x108   : > { %v5490_v47 = vadd.f32 %v3809_v3, %v3808_v32  ;;  %v5492_v34 = vadd.f32 %v3881_v62, %v3880_v13  ;;  %v5520_v32 = vld [vmem:[%s4765_s6 + $0x9c] sm:$0xff]  }
 0x109   : > { %v3811_v9 = vpop.f32.mrf.mxu0  ;;  %v3883_v36 = vpop.f32.mrf.mxu1  ;;  %v2501_v41 = vshrl.u32 %v5520_v32, 16 }
 0x10b   : > { %v3812_v35 = vpop.f32.mrf.mxu0  ;;  %v3884_v5 = vpop.f32.mrf.mxu1 }
 0x10c   : > { %v5500_v21 = vadd.f32 %v3812_v35, %v3811_v9  ;;  %v5502_v28 = vadd.f32 %v3884_v5, %v3883_v36  ;;  %v2586_v9 = vrot.slane %v5379_v49, 1  ;;  %v2588_v36 = vrot.slane %v5389_v12, 1 }
 0x10d   : > { %v3814_v29 = vpop.f32.mrf.mxu0  ;;  %v3886_v43 = vpop.f32.mrf.mxu1  ;;  %2006 = vmatmul.mubr.bf16.gmra.mxu1 %v5325_v42  ;;  %2922 = vmatmul.mubr.bf16.gmra.mxu0 %v5437_v57 }
 0x10e   : > { %2929 = vmatprep.mubr.bf16.mxu0 %v2475_v17  ;;  %4300 = vmatprep.mubr.bf16.mxu1 %v5344_v0  ;;  %v2489_v0 = vshrl.u32 %v5498_v25, 16  ;;  %v2590_v20 = vsel %vm616_vm1, %v2588_v36, %v2589_v6 }
 0x10f   : > { %v3815_v31 = vpop.f32.mrf.mxu0  ;;  %v3887_v18 = vpop.f32.mrf.mxu1 }
 0x110   : > { %v3816_v48 = vadd.f32 %v3815_v31, %v3814_v29  ;;  %v5513_v42 = vadd.f32 %v3887_v18, %v3886_v43  ;;  %v2494_v17 = vor.u32 %v2493_v26, %v2489_v0  ;;  %v2587_v43 = vsel %vm616_vm1, %v2585_v63, %v2586_v9 }
 0x111   : > { %v3817_v58 = vpop.f32.mrf.mxu0  ;;  %v3889_v50 = vpop.f32.mrf.mxu1  ;;  %v2591_v0 = vrot.slane %v5405_v16, 1 }
 0x112   : > { %v2499_v18 = vsel %vm407_vm0, %v2494_v17, %v2498_v1 }
 0x113   : > { %v3818_v53 = vpop.f32.mrf.mxu0  ;;  %v3890_v22 = vpop.f32.mrf.mxu1 }
 0x114   : > { %v3819_v13 = vadd.f32 %v3818_v53, %v3817_v58  ;;  %v5522_v3 = vadd.f32 %v3890_v22, %v3889_v50  ;;  %v2592_v22 = vrot.slane %v5411_v8, 1 }
 0x115   : > { %v3820_v62 = vpop.f32.mrf.mxu0  ;;  %v4206_v45 = vpop.f32.mrf.mxu1  ;;  %2930 = vmatmul.mubr.bf16.gmra.mxu0 %v5457_v14  ;;  %4301 = vmatmul.mubr.bf16.vlgmr.msra.gmra.mxu1 %v5347_v15  ;;  %v2503_v15 = vshll.u32 %v5520_v32, 16 }
 0x116   : > { %v5527_v4 = vadd.f32 %v4206_v45, %v5469_v33  ;;  %2937 = vmatprep.mubr.bf16.mxu0 %v2487_v56  ;;  %4304 = vmatprep.mubr.bf16.mxu1 %v2584_v54  ;;  %v2594_v56 = vrot.slane %v5421_v61, 1  ;;  %v2595_v54 = vrot.slane %v5427_v52, 1  ;;  %v5566_v45 = vld [vmem:[%s4765_s6 + $0xb0] ss:$0 sps:$4 sm:$0x11]   ;;  %v2593_v61 = vsel %vm616_vm1, %v2591_v0, %v2592_v22 }
 0x117   : > { %v3821_v35 = vpop.f32.mrf.mxu0  ;;  %v1582_v5 = vpop.f32.mrf.mxu1  ;;  %v2505_v37 = vrot.slane %v2503_v15, 1  ;;  %v2520_v15 = vshll.u32 %v5566_v45, 16 }
 0x118   : > { %v5537_v33 = vadd.f32 %v3821_v35, %v3820_v62  ;;  %v5540_v29 = vadd.f32 %v5446_v7, %v1582_v5  ;;  %v5551_v7 = vld [vmem:[%s4765_s6 + $0xa8] sm:$0xff]   ;;  %v2510_v62 = vrot.slane %v2508_v38, 1  ;;  %v2596_v52 = vsel %vm616_vm1, %v2594_v56, %v2595_v54 }
 0x119   : > { %v3823_v40 = vpop.f32.mrf.mxu0  ;;  %v4207_v49 = vpop.f32.mrf.mxu1  ;;  %v2506_v10 = vor.u32 %v2505_v37, %v2501_v41  ;;  %v2515_v63 = vshll.u32 %v5551_v7, 16  ;;  %v2513_v1 = vshrl.u32 %v5551_v7, 16  ;;  %v2522_v38 = vrot.slane %v2520_v15, 1 }
 0x11a   : > { %v5543_v12 = vadd.f32 %v4207_v49, %v5480_v46 }
 0x11b   : > { %v3824_v30 = vpop.f32.mrf.mxu0  ;;  %v1585_v31 = vpop.f32.mrf.mxu1  ;;  %v2511_v17 = vsel %vm407_vm0, %v2506_v10, %v2510_v62  ;;  %v2517_v6 = vrot.slane %v2515_v63, 1 }
 0x11c   : > { %v5553_v44 = vadd.f32 %v3824_v30, %v3823_v40  ;;  %v5556_v46 = vadd.f32 %v5459_v27, %v1585_v31  ;;  %v5580_v40 = vld [vmem:[%s4765_s6 + $0xb4] sm:$0xff]   ;;  %v2597_v30 = vrot.slane %v5437_v57, 1  ;;  %v2598_v31 = vrot.slane %v5443_v59, 1 }
 0x11d   : > { %v3826_v58 = vpop.f32.mrf.mxu0  ;;  %v4210_v50 = vpop.f32.mrf.mxu1  ;;  %2938 = vmatmul.mubr.bf16.gmra.mxu0 %v5478_v51  ;;  %4305 = vmatmul.mubr.bf16.gmra.mxu1 %v2587_v43  ;;  %v2527_v0 = vshll.u32 %v5580_v40, 16 }
 0x11e   : > { %v5560_v53 = vadd.f32 %v4210_v50, %v3816_v48  ;;  %2945 = vmatprep.mubr.bf16.mxu0 %v2499_v18  ;;  %4308 = vmatprep.mubr.bf16.mxu1 %v2590_v20  ;;  %v2600_v18 = vrot.slane %v5457_v14, 1  ;;  %v5593_v50 = vld [vmem:[%s4765_s6 + $0xbc] ss:$0 sps:$4 sm:$0x11]   ;;  %v2599_v14 = vsel %vm616_vm1, %v2597_v30, %v2598_v31 }
 0x11f   : > { %v3827_v27 = vpop.f32.mrf.mxu0  ;;  %v1598_v26 = vpop.f32.mrf.mxu1  ;;  %v2529_v63 = vrot.slane %v2527_v0, 1 }
 0x120   : > { %v3828_v16 = vadd.f32 %v3827_v27, %v3826_v58  ;;  %v5570_v48 = vadd.f32 %v5490_v47, %v1598_v26  ;;  %v2601_v58 = vrot.slane %v5466_v19, 1  ;;  %v2525_v27 = vshrl.u32 %v5580_v40, 16 }
 0x121   : > { %v3829_v9 = vpop.f32.mrf.mxu0  ;;  %v4211_v36 = vpop.f32.mrf.mxu1 }
 0x122   : > { %v5572_v8 = vadd.f32 %v4211_v36, %v3819_v13  ;;  %v2602_v62 = vsel %vm616_vm1, %v2600_v18, %v2601_v58  ;;  %v2530_v15 = vor.u32 %v2529_v63, %v2525_v27 }
 0x123   : > { %v3830_v35 = vpop.f32.mrf.mxu0  ;;  %v1601_v5 = vpop.f32.mrf.mxu1 }
 0x124   : > { %v3831_v47 = vadd.f32 %v3830_v35, %v3829_v9  ;;  %v5583_v49 = vadd.f32 %v5500_v21, %v1601_v5  ;;  %v2518_v21 = vor.u32 %v2517_v6, %v2513_v1  ;;  %v5607_v9 = vld [vmem:[%s4765_s6 + $0xc0] sm:$0xff]   ;;  %v2603_v35 = vrot.slane %v5478_v51, 1 }
 0x125   : > { %v3832_v13 = vpop.f32.mrf.mxu0  ;;  %v4214_v43 = vpop.f32.mrf.mxu1  ;;  %2946 = vmatmul.mubr.bf16.gmra.mxu0 %v5498_v25  ;;  %4309 = vmatmul.mubr.bf16.gmra.mxu1 %v2593_v61  ;;  %v2604_v5 = vrot.slane %v5487_v60, 1 }
 0x126   : > { %v5586_v41 = vadd.f32 %v4214_v43, %v3828_v16  ;;  %2953 = vmatprep.mubr.bf16.mxu0 %v2511_v17  ;;  %4312 = vmatprep.mubr.bf16.mxu1 %v2596_v52  ;;  %v2523_v19 = vsel %vm407_vm0, %v2518_v21, %v2522_v38  ;;  %v2532_v16 = vshll.u32 %v5593_v50, 16  ;;  %v2606_v17 = vrot.slane %v5498_v25, 1 }
 0x127   : > { %v3833_v20 = vpop.f32.mrf.mxu0  ;;  %v1614_v37 = vpop.f32.mrf.mxu1  ;;  %v2539_v43 = vshll.u32 %v5607_v9, 16  ;;  %v2605_v60 = vsel %vm616_vm1, %v2603_v35, %v2604_v5  ;;  %v2537_v25 = vshrl.u32 %v5607_v9, 16  ;;  %v4573_v35 = vld [vmem:[%s4765_s6 + $0xd4] ss:$0 sps:$4 sm:$0x11]  }
 0x128   : > { %v3834_v22 = vadd.f32 %v3833_v20, %v3832_v13  ;;  %v5597_v56 = vadd.f32 %v5537_v33, %v1614_v37  ;;  %v5618_v13 = vld [vmem:[%s4765_s6 + $0xc8] ss:$0 sps:$4 sm:$0x11]  }
 0x129   : > { %v3835_v57 = vpop.f32.mrf.mxu0  ;;  %v4215_v54 = vpop.f32.mrf.mxu1  ;;  %v2541_v58 = vrot.slane %v2539_v43, 1  ;;  %v2544_v0 = vshll.u32 %v5618_v13, 16 }
 0x12a   : > { %v5599_v59 = vadd.f32 %v4215_v54, %v3831_v47  ;;  %v2534_v47 = vrot.slane %v2532_v16, 1 }
 0x12b   : > { %v3836_v26 = vpop.f32.mrf.mxu0  ;;  %v1617_v10 = vpop.f32.mrf.mxu1 }
 0x12c   : > { %v3837_v33 = vadd.f32 %v3836_v26, %v3835_v57  ;;  %v5610_v36 = vadd.f32 %v5553_v44, %v1617_v10  ;;  %v2607_v44 = vrot.slane %v5510_v11, 1  ;;  %v2535_v11 = vsel %vm407_vm0, %v2530_v15, %v2534_v47  ;;  %v5631_v57 = vld [vmem:[%s4765_s6 + $0xcc] sm:$0xff]   ;;  %s199_s6 = sand.u32 1, %s4634_s13  }
 0x12d   : > { %v3838_v61 = vpop.f32.mrf.mxu0  ;;  %v4218_v52 = vpop.f32.mrf.mxu1  ;;  %2954 = vmatmul.mubr.bf16.gmra.mxu0 %v5520_v32  ;;  %4313 = vmatmul.mubr.bf16.gmra.mxu1 %v2599_v14  ;;  %v2609_v10 = vrot.slane %v5520_v32, 1  ;;  %v2551_v5 = vshll.u32 %v5631_v57, 16  ;;  %s3411_s4 = sshll.u32 %s199_s6, 8  ;;  %s6105_s15 = scalar_lea.sflag [#allocation3], %s199_s6 }
 0x12e   : > { %2961 = vmatprep.mubr.bf16.mxu0 %v2523_v19  ;;  %4316 = vmatprep.mubr.bf16.mxu1 %v2602_v62  ;;  %v2608_v38 = vsel %vm616_vm1, %v2606_v17, %v2607_v44  ;;  %v2610_v19 = vrot.slane %v5534_v55, 1  ;;  %v2612_v62 = vrot.slane %v5551_v7, 1  ;;  %v2549_v55 = vshrl.u32 %v5631_v57, 16  ;;  %s5947_s5 = scalar_lea.vmem [#allocation2], %s3411_s4 }
 0x12f   : > { %v3839_v1 = vpop.f32.mrf.mxu0  ;;  %v1630_v6 = vpop.f32.mrf.mxu1  ;;  %s3305_s8 = sshll.u32 %s5947_s5, 4  ;;  %s6099_s8 = int_to_ptr.vmem [resolvable:$true] %s3305_s8 }
 0x130   : > { %v3840_v30 = vadd.f32 %v3839_v1, %v3838_v61  ;;  %v5621_v31 = vadd.f32 %v3834_v22, %v1630_v6  ;;  %v2546_v61 = vrot.slane %v2544_v0, 1  ;;  %v2611_v32 = vsel %vm616_vm1, %v2609_v10, %v2610_v19  ;;  %s4574_s18 = scalar_lea.vmem %s6099_s8, 4096  ;;  %p4581_p1 = scmp.lt.s32.totalorder %s6099_s8, %s4579_s21 }
 0x131   : > { %v3841_v18 = vpop.f32.mrf.mxu0  ;;  %v4219_v51 = vpop.f32.mrf.mxu1  ;;  %p4575_p12 = scmp.ne.s32.totalorder %s6099_s8, %s4574_s18  ;;  %p4582_p2 = scmp.lt.s32.totalorder %s4580_s23, %s4574_s18 }
 0x132   : > { %v5623_v20 = vadd.f32 %v4218_v52, %v3840_v30  ;;  %v2613_v52 = vrot.slane %v5566_v45, 1  ;;  %v2553_v30 = vrot.slane %v2551_v5, 1  ;;  %v2556_v45 = vshll.u32 %v4573_v35, 16 }
 0x133   : > { %v3842_v37 = vpop.f32.mrf.mxu0  ;;  %v1633_v21 = vpop.f32.mrf.mxu1  ;;  %p4576_p13 = pnand %p4575_p12, %p4715_p4  ;;  %p4583_p3 = por %p4582_p2, %p4581_p1 }
 0x134   : > { %v3843_v22 = vadd.f32 %v3842_v37, %v3841_v18  ;;  %v5633_v54 = vadd.f32 %v3837_v33, %v1633_v21  ;;  %v2542_v33 = vor.u32 %v2541_v58, %v2537_v25  ;;  %v2614_v43 = vsel %vm616_vm1, %v2612_v62, %v2613_v52 }
 0x135   : > { %v3844_v14 = vpop.f32.mrf.mxu0  ;;  %v4222_v27 = vpop.f32.mrf.mxu1  ;;  %2962 = vmatmul.mubr.bf16.gmra.mxu0 %v5551_v7  ;;  %4317 = vmatmul.mubr.bf16.gmra.mxu1 %v2605_v60  ;;  %v2615_v37 = vrot.slane %v5580_v40, 1  ;;  %v2616_v21 = vrot.slane %v5593_v50, 1  ;;  %v2554_v58 = vor.u32 %v2553_v30, %v2549_v55  ;;  %v2558_v0 = vrot.slane %v2556_v45, 1  ;;  %p4577_p0 = pneg %p4576_p13 }
 0x136   : > { %v5636_v26 = vadd.f32 %v4219_v51, %v3843_v22  ;;  %2969 = vmatprep.mubr.bf16.mxu0 %v2535_v11  ;;  %4320 = vmatprep.mubr.bf16.mxu1 %v2608_v38  ;;  %v2547_v44 = vsel %vm407_vm0, %v2542_v33, %v2546_v61  ;;  %v2618_v22 = vrot.slane %v5607_v9, 1 }
 0x137   : > { %v3845_v63 = vpop.f32.mrf.mxu0  ;;  %v1646_v16 = vpop.f32.mrf.mxu1  ;;  %p4584_p5 = pnand %p4583_p3, %p4577_p0 }
 0x138   : > { %v3846_v17 = vadd.f32 %v3845_v63, %v3844_v14  ;;  %v2619_v14 = vrot.slane %v5618_v13, 1 }
 0x139   : > { %v3847_v1 = vpop.f32.mrf.mxu0  ;;  %v4223_v6 = vpop.f32.mrf.mxu1 }
 0x13a   : > { %v5644_v15 = vadd.f32 %v3846_v17, %v1646_v16  ;;  %v2617_v16 = vsel %vm616_vm1, %v2615_v37, %v2616_v21  ;;  %v2620_v50 = vsel %vm616_vm1, %v2618_v22, %v2619_v14 }
 0x13b   : > { %v3848_v47 = vpop.f32.mrf.mxu0  ;;  %v1649_v7 = vpop.f32.mrf.mxu1 }
 0x13c   : > { %v3849_v18 = vadd.f32 %v3848_v47, %v3847_v1 }
 0x13d   : > { %v3850_v51 = vpop.f32.mrf.mxu0  ;;  %v4226_v60 = vpop.f32.mrf.mxu1  ;;  %2970 = vmatmul.mubr.bf16.gmra.mxu0 %v5580_v40  ;;  %4321 = vmatmul.mubr.bf16.gmra.mxu1 %v2611_v32  ;;  %v2559_v40 = vsel %vm407_vm0, %v2554_v58, %v2558_v0  ;;  %v2622_v32 = vrot.slane %v4573_v35, 1 }
 0x13e   : > { %v5651_v25 = vadd.f32 %v3849_v18, %v1649_v7  ;;  %2977 = vmatprep.mubr.bf16.mxu0 %v2547_v44  ;;  %4324 = vmatprep.mubr.bf16.mxu1 %v2614_v43 }
 0x13f   : > { %v3851_v11 = vpop.f32.mrf.mxu0  ;;  %v1662_v38 = vpop.f32.mrf.mxu1 }
 0x140   : > { %v3852_v10 = vadd.f32 %v3851_v11, %v3850_v51 }
 0x141   : > { %v3853_v19 = vpop.f32.mrf.mxu0  ;;  %v4227_v62 = vpop.f32.mrf.mxu1 }
 0x142   : > { %v5657_v63 = vadd.f32 %v4222_v27, %v3852_v10  ;;  %v2621_v27 = vrot.slane %v5631_v57, 1 }
 0x143   : > { %v3854_v33 = vpop.f32.mrf.mxu0  ;;  %v1665_v61 = vpop.f32.mrf.mxu1 }
 0x144   : > { %v3855_v52 = vadd.f32 %v3854_v33, %v3853_v19 }
 0x145   : > { %v3856_v5 = vpop.f32.mrf.mxu0  ;;  %v4230_v17 = vpop.f32.mrf.mxu1  ;;  %2978 = vmatmul.mubr.bf16.gmra.mxu0 %v5607_v9  ;;  %4325 = vmatmul.mubr.bf16.gmra.mxu1 %v2617_v16 }
 0x146   : > { %v5663_v13 = vadd.f32 %v4223_v6, %v3855_v52  ;;  %v5666_v1 = vadd.f32 %v4230_v17, %v5471_v24  ;;  %2985 = vmatprep.mubr.bf16.mxu0 %v2559_v40  ;;  %4328 = vmatprep.mubr.bf16.mxu1 %v2620_v50  ;;  %v2623_v24 = vsel %vm616_vm1, %v2621_v27, %v2622_v32 }
 0x147   : > { %v3857_v55 = vpop.f32.mrf.mxu0  ;;  %v1678_v47 = vpop.f32.mrf.mxu1 }
 0x148   : > { %v3858_v7 = vadd.f32 %v3857_v55, %v3856_v5  ;;  %v5670_v44 = vadd.f32 %v5448_v2, %v1678_v47 }
 0x149   : > { %v3859_v43 = vpop.f32.mrf.mxu0  ;;  %v4231_v30 = vpop.f32.mrf.mxu1 }
 0x14a   : > { %v5672_v9 = vadd.f32 %v3858_v7, %v1662_v38  ;;  %v5675_v6 = vadd.f32 %v4231_v30, %v5482_v23 }
 0x14b   : > { %v3860_v45 = vpop.f32.mrf.mxu0  ;;  %v1681_v18 = vpop.f32.mrf.mxu1 }
 0x14c   : > { %v3861_v51 = vadd.f32 %v3860_v45, %v3859_v43  ;;  %v5679_v35 = vadd.f32 %v5461_v39, %v1681_v18 }
 0x14d   : > { %v3862_v37 = vpop.f32.mrf.mxu0  ;;  %v4234_v21 = vpop.f32.mrf.mxu1  ;;  %2986 = vmatmul.mubr.bf16.gmra.mxu0 %v5631_v57  ;;  %4329 = vmatmul.mubr.bf16.gmra.mxu1 %v2623_v24 }
 0x14e   : > { %v5682_v2 = vadd.f32 %v3861_v51, %v1665_v61  ;;  %v5685_v11 = vadd.f32 %v4234_v21, %v5513_v42 }
 0x14f   : > { %v3863_v23 = vpop.f32.mrf.mxu0  ;;  %v1694_v38 = vpop.f32.mrf.mxu1 }
 0x150   : > { %v3864_v58 = vadd.f32 %v3863_v23, %v3862_v37  ;;  %v5688_v0 = vadd.f32 %v5492_v34, %v1694_v38 }
 0x151   : > { %v3865_v22 = vpop.f32.mrf.mxu0  ;;  %v4235_v14 = vpop.f32.mrf.mxu1 }
 0x152   : > { %v5690_v39 = vadd.f32 %v4226_v60, %v3864_v58  ;;  %v5693_v10 = vadd.f32 %v4235_v14, %v5522_v3 }
 0x153   : > { %v3866_v57 = vpop.f32.mrf.mxu0  ;;  %v1697_v19 = vpop.f32.mrf.mxu1 }
 0x154   : > { %v3867_v16 = vadd.f32 %v3866_v57, %v3865_v22  ;;  %v5696_v33 = vadd.f32 %v5502_v28, %v1697_v19 }
 0x155   : > { %v3932_v42 = vpop.f32.mrf.mxu1  ;;  %v4254_v61 = vpop.f32.mrf.mxu0 }
 0x156   : > { %v5698_v40 = vadd.f32 %v4227_v62, %v3867_v16 }
 0x157   : > { %v3933_v50 = vpop.f32.mrf.mxu1  ;;  %v2048_v34 = vpop.f32.mrf.mxu0 }
 0x158   : > { %v3934_v52 = vadd.f32 %v3933_v50, %v3932_v42 }
 0x159   : > { %v3935_v5 = vpop.f32.mrf.mxu1  ;;  %v4255_v17 = vpop.f32.mrf.mxu0 }
 0x15a   : > { %v1888_v60 = vadd.f32 %v3934_v52, %v5540_v29 }
 0x15b   : > { %v3936_v27 = vpop.f32.mrf.mxu1  ;;  %v2051_v3 = vpop.f32.mrf.mxu0 }
 0x15c   : > { %v5701_v32 = vadd.f32 %v2048_v34, %v1888_v60  ;;  %v3937_v55 = vadd.f32 %v3936_v27, %v3935_v5 }
 0x15d   : > { %v3938_v47 = vpop.f32.mrf.mxu1  ;;  %v4258_v7 = vpop.f32.mrf.mxu0 }
 0x15e   : > { %v1891_v28 = vadd.f32 %v3937_v55, %v5556_v46 }
 0x15f   : > { %v3939_v43 = vpop.f32.mrf.mxu1  ;;  %v2064_v30 = vpop.f32.mrf.mxu0 }
 0x160   : > { %v5704_v62 = vadd.f32 %v2051_v3, %v1891_v28  ;;  %v3940_v24 = vadd.f32 %v3939_v43, %v3938_v47 }
 0x161   : > { %v3941_v45 = vpop.f32.mrf.mxu1  ;;  %v4259_v18 = vpop.f32.mrf.mxu0 }
 0x162   : > { %v1896_v51 = vadd.f32 %v3940_v24, %v5527_v4 }
 0x163   : > { %v3942_v37 = vpop.f32.mrf.mxu1  ;;  %v2067_v29 = vpop.f32.mrf.mxu0 }
 0x164   : > { %v3943_v21 = vadd.f32 %v3942_v37, %v3941_v45  ;;  %v5707_v23 = vadd.f32 %v4254_v61, %v1896_v51 }
 0x165   : > { %v3944_v38 = vpop.f32.mrf.mxu1  ;;  %v4262_v58 = vpop.f32.mrf.mxu0 }
 0x166   : > { %v1899_v22 = vadd.f32 %v3943_v21, %v5543_v12 }
 0x167   : > { %v3945_v14 = vpop.f32.mrf.mxu1  ;;  %v2080_v46 = vpop.f32.mrf.mxu0 }
 0x168   : > { %v3946_v57 = vadd.f32 %v3945_v14, %v3944_v38  ;;  %v5710_v19 = vadd.f32 %v4255_v17, %v1899_v22 }
 0x169   : > { %v3947_v16 = vpop.f32.mrf.mxu1  ;;  %v4263_v42 = vpop.f32.mrf.mxu0 }
 0x16a   : > { %v1904_v50 = vadd.f32 %v3946_v57, %v5570_v48 }
 0x16b   : > { %v3948_v34 = vpop.f32.mrf.mxu1  ;;  %v2083_v4 = vpop.f32.mrf.mxu0 }
 0x16c   : > { %v3949_v52 = vadd.f32 %v3948_v34, %v3947_v16  ;;  %v5713_v5 = vadd.f32 %v2064_v30, %v1904_v50 }
 0x16d   : > { %v3950_v61 = vpop.f32.mrf.mxu1  ;;  %v5715_v60 = vpop.f32.mrf.mxu0 }
 0x16e   : > { %v1907_v27 = vadd.f32 %v3949_v52, %v5583_v49 }
 0x16f   : > { %v3951_v12 = vpop.f32.mrf.mxu1  ;;  %v2096_v3 = vpop.f32.mrf.mxu0 }
 0x170   : > { %v3952_v55 = vadd.f32 %v3951_v12, %v3950_v61  ;;  %v5718_v47 = vadd.f32 %v2067_v29, %v1907_v27 }
 0x171   : > { %v3953_v17 = vpop.f32.mrf.mxu1  ;;  %v5720_v28 = vpop.f32.mrf.mxu0 }
 0x172   : > { %v1912_v48 = vadd.f32 %v3952_v55, %v5560_v53 }
 0x173   : > { %v3954_v43 = vpop.f32.mrf.mxu1  ;;  %v2099_v24 = vpop.f32.mrf.mxu0 }
 0x174   : > { %v3955_v45 = vadd.f32 %v3954_v43, %v3953_v17  ;;  %v5723_v30 = vadd.f32 %v4258_v7, %v1912_v48 }
 0x175   : > { %v3956_v51 = vpop.f32.mrf.mxu1  ;;  %v5725_v37 = vpop.f32.mrf.mxu0 }
 0x176   : > { %v1915_v49 = vadd.f32 %v3955_v45, %v5572_v8 }
 0x177   : > { %v3957_v21 = vpop.f32.mrf.mxu1  ;;  %v5728_v38 = vpop.f32.mrf.mxu0 }
 0x178   : > { %v3958_v29 = vadd.f32 %v3957_v21, %v3956_v51  ;;  %v5730_v22 = vadd.f32 %v4259_v18, %v1915_v49 }
 0x179   : > { %v3959_v14 = vpop.f32.mrf.mxu1  ;;  %v5732_v57 = vpop.f32.mrf.mxu0 }
 0x17a   : > { %v1920_v53 = vadd.f32 %v3958_v29, %v5597_v56 }
 0x17b   : > { %v3960_v16 = vpop.f32.mrf.mxu1  ;;  %v5735_v50 = vpop.f32.mrf.mxu0 }
 0x17c   : > { %v3961_v7 = vadd.f32 %v3960_v16, %v3959_v14  ;;  %v5737_v34 = vadd.f32 %v2080_v46, %v1920_v53 }
 0x17d   : > { %v3962_v52 = vpop.f32.mrf.mxu1  ;;  %v5739_v61 = vpop.f32.mrf.mxu0 }
 0x17e   : > { %v1923_v8 = vadd.f32 %v3961_v7, %v5610_v36 }
 0x17f   : > { %v3963_v27 = vpop.f32.mrf.mxu1  ;;  %v5742_v12 = vpop.f32.mrf.mxu0 }
 0x180   : > { %v3964_v18 = vadd.f32 %v3963_v27, %v3962_v52  ;;  %v5744_v55 = vadd.f32 %v2083_v4, %v1923_v8 }
 0x181   : > { %v3965_v17 = vpop.f32.mrf.mxu1  ;;  %v5746_v48 = vpop.f32.mrf.mxu0 }
 0x182   : > { %v1928_v56 = vadd.f32 %v3964_v18, %v5586_v41 }
 0x183   : > { %v3966_v43 = vpop.f32.mrf.mxu1  ;;  %v5749_v45 = vpop.f32.mrf.mxu0 }
 0x184   : > { %v3967_v46 = vadd.f32 %v3966_v43, %v3965_v17  ;;  %v5751_v51 = vadd.f32 %v4262_v58, %v1928_v56 }
 0x185   : > { %v3968_v49 = vpop.f32.mrf.mxu1  ;;  %v5753_v21 = vpop.f32.mrf.mxu0 }
 0x186   : > { %v1931_v36 = vadd.f32 %v3967_v46, %v5599_v59 }
 0x187   : > { %v3969_v29 = vpop.f32.mrf.mxu1  ;;  %v5756_v14 = vpop.f32.mrf.mxu0 }
 0x188   : > { %v3970_v4 = vadd.f32 %v3969_v29, %v3968_v49  ;;  %v5758_v53 = vadd.f32 %v4263_v42, %v1931_v36 }
 0x189   : > { %v3971_v16 = vpop.f32.mrf.mxu1  ;;  %v5760_v7 = vpop.f32.mrf.mxu0 }
 0x18a   : > { %v1936_v41 = vadd.f32 %v3970_v4, %v5621_v31 }
 0x18b   : > { %v3972_v52 = vpop.f32.mrf.mxu1  ;;  %v5763_v8 = vpop.f32.mrf.mxu0 }
 0x18c   : > { %v3973_v58 = vadd.f32 %v3972_v52, %v3971_v16  ;;  %v5765_v27 = vadd.f32 %v2096_v3, %v1936_v41 }
 0x18d   : > { %v3974_v18 = vpop.f32.mrf.mxu1  ;;  %v5767_v17 = vpop.f32.mrf.mxu0 }
 0x18e   : > { %6156 = vst [vmem:[#allocation5_spill] sm:$0xff] %v5767_v17  ;;  %v1939_v59 = vadd.f32 %v3973_v58, %v5633_v54 }
 0x18f   : > { %v3975_v56 = vpop.f32.mrf.mxu1  ;;  %v5770_v43 = vpop.f32.mrf.mxu0 }
 0x190   : > { %v3976_v42 = vadd.f32 %v3975_v56, %v3974_v18  ;;  %v5772_v46 = vadd.f32 %v2099_v24, %v1939_v59 }
 0x191   : > { %v3977_v49 = vpop.f32.mrf.mxu1  ;;  %v5774_v36 = vpop.f32.mrf.mxu0 }
 0x192   : > { %6157 = vst [vmem:[#allocation6_spill] sm:$0xff] %v5774_v36  ;;  %v1944_v31 = vadd.f32 %v3976_v42, %v5623_v20 }
 0x193   : > { %v3978_v29 = vpop.f32.mrf.mxu1  ;;  %v5777_v4 = vpop.f32.mrf.mxu0 }
 0x194   : > { %v3979_v3 = vadd.f32 %v3978_v29, %v3977_v49  ;;  %v5780_v16 = vadd.f32 %v5715_v60, %v1944_v31 }
 0x195   : > { %v3980_v41 = vpop.f32.mrf.mxu1  ;;  %v5782_v54 = vpop.f32.mrf.mxu0 }
 0x196   : > { %v1947_v52 = vadd.f32 %v3979_v3, %v5636_v26 }
 0x197   : > { %v3981_v58 = vpop.f32.mrf.mxu1  ;;  %v5785_v24 = vpop.f32.mrf.mxu0 }
 0x198   : > { %v3982_v18 = vadd.f32 %v3981_v58, %v3980_v41  ;;  %v5788_v59 = vadd.f32 %v5720_v28, %v1947_v52 }
 0x199   : > { %v3983_v20 = vpop.f32.mrf.mxu1  ;;  %v5790_v56 = vpop.f32.mrf.mxu0 }
 0x19a   : > { %v1952_v42 = vadd.f32 %v3982_v18, %v5644_v15 }
 0x19b   : > { %v3984_v49 = vpop.f32.mrf.mxu1  ;;  %v5793_v60 = vpop.f32.mrf.mxu0 }
 0x19c   : > { %v3985_v31 = vadd.f32 %v3984_v49, %v3983_v20  ;;  %v5796_v29 = vadd.f32 %v5728_v38, %v1952_v42 }
 0x19d   : > { %v3986_v26 = vpop.f32.mrf.mxu1  ;;  %v5798_v3 = vpop.f32.mrf.mxu0 }
 0x19e   : > { %6158 = vst [vmem:[#allocation7_spill] sm:$0xff] %v5796_v29  ;;  %v1955_v41 = vadd.f32 %v3985_v31, %v5651_v25 }
 0x19f   : > { %v3987_v58 = vpop.f32.mrf.mxu1  ;;  %v5801_v28 = vpop.f32.mrf.mxu0 }
 0x1a0   : > { %v3988_v52 = vadd.f32 %v3987_v58, %v3986_v26  ;;  %v5804_v36 = vadd.f32 %v5735_v50, %v1955_v41 }
 0x1a1   : > { %v3989_v15 = vpop.f32.mrf.mxu1  ;;  %v5806_v18 = vpop.f32.mrf.mxu0 }
 0x1a2   : > { %6159 = vst [vmem:[#allocation8_spill] sm:$0xff] %v5804_v36  ;;  %v1960_v20 = vadd.f32 %v3988_v52, %v5657_v63 }
 0x1a3   : > { %v3990_v49 = vpop.f32.mrf.mxu1  ;;  %v5809_v38 = vpop.f32.mrf.mxu0 }
 0x1a4   : > { %v3991_v42 = vadd.f32 %v3990_v49, %v3989_v15  ;;  %v5812_v17 = vadd.f32 %v5725_v37, %v1960_v20 }
 0x1a5   : > { %v3992_v25 = vpop.f32.mrf.mxu1  ;;  %v5814_v31 = vpop.f32.mrf.mxu0 }
 0x1a6   : > { %v1963_v26 = vadd.f32 %v3991_v42, %v5663_v13 }
 0x1a7   : > { %v3993_v58 = vpop.f32.mrf.mxu1  ;;  %v5817_v50 = vpop.f32.mrf.mxu0 }
 0x1a8   : > { %v3994_v41 = vadd.f32 %v3993_v58, %v3992_v25  ;;  %v5820_v36 = vadd.f32 %v5732_v57, %v1963_v26 }
 0x1a9   : > { %v3995_v63 = vpop.f32.mrf.mxu1  ;;  %v5822_v52 = vpop.f32.mrf.mxu0 }
 0x1aa   : > { %6160 = vst [vmem:[#allocation9_spill] sm:$0xff] %v5820_v36  ;;  %v1968_v15 = vadd.f32 %v3994_v41, %v5672_v9 }
 0x1ab   : > { %v3996_v49 = vpop.f32.mrf.mxu1  ;;  %v5825_v37 = vpop.f32.mrf.mxu0 }
 0x1ac   : > { %v3997_v20 = vadd.f32 %v3996_v49, %v3995_v63  ;;  %v5828_v29 = vadd.f32 %v5742_v12, %v1968_v15 }
 0x1ad   : > { %v3998_v13 = vpop.f32.mrf.mxu1  ;;  %v5830_v42 = vpop.f32.mrf.mxu0 }
 0x1ae   : > { %6161 = vst [vmem:[#allocation10_spill] sm:$0xff] %v5828_v29  ;;  %v1971_v25 = vadd.f32 %v3997_v20, %v5682_v2 }
 0x1af   : > { %v3999_v58 = vpop.f32.mrf.mxu1  ;;  %v5833_v57 = vpop.f32.mrf.mxu0 }
 0x1b0   : > { %v4000_v26 = vadd.f32 %v3999_v58, %v3998_v13  ;;  %v5836_v36 = vadd.f32 %v5749_v45, %v1971_v25 }
 0x1b1   : > { %v4001_v9 = vpop.f32.mrf.mxu1  ;;  %v5838_v41 = vpop.f32.mrf.mxu0 }
 0x1b2   : > { %6162 = vst [vmem:[#allocation11_spill] sm:$0xff] %v5836_v36  ;;  %v1976_v63 = vadd.f32 %v4000_v26, %v5690_v39 }
 0x1b3   : > { %v4002_v49 = vpop.f32.mrf.mxu1  ;;  %v5841_v12 = vpop.f32.mrf.mxu0 }
 0x1b4   : > { %v4003_v15 = vadd.f32 %v4002_v49, %v4001_v9  ;;  %v5844_v29 = vadd.f32 %v5739_v61, %v1976_v63 }
 0x1b5   : > { %v4004_v2 = vpop.f32.mrf.mxu1  ;;  %v5846_v20 = vpop.f32.mrf.mxu0 }
 0x1b6   : > { %6163 = vst [vmem:[#allocation12_spill] sm:$0xff] %v5844_v29  ;;  %v1979_v13 = vadd.f32 %v4003_v15, %v5698_v40 }
 0x1b7   : > { %v4005_v58 = vpop.f32.mrf.mxu1  ;;  %v5849_v45 = vpop.f32.mrf.mxu0 }
 0x1b8   : > { %v4006_v25 = vadd.f32 %v4005_v58, %v4004_v2  ;;  %v5852_v36 = vadd.f32 %v5746_v48, %v1979_v13 }
 0x1b9   : > { %v4007_v39 = vpop.f32.mrf.mxu1  ;;  %v5854_v26 = vpop.f32.mrf.mxu0 }
 0x1ba   : > { %6164 = vst [vmem:[#allocation13_spill] sm:$0xff] %v5852_v36  ;;  %v1984_v9 = vadd.f32 %v4006_v25, %v5670_v44 }
 0x1bb   : > { %v4008_v49 = vpop.f32.mrf.mxu1  ;;  %v5857_v61 = vpop.f32.mrf.mxu0 }
 0x1bc   : > { %v4009_v63 = vadd.f32 %v4008_v49, %v4007_v39  ;;  %v5860_v29 = vadd.f32 %v5756_v14, %v1984_v9 }
 0x1bd   : > { %v4010_v40 = vpop.f32.mrf.mxu1  ;;  %v5862_v15 = vpop.f32.mrf.mxu0 }
 0x1be   : > { %6165 = vst [vmem:[#allocation14_spill] sm:$0xff] %v5860_v29  ;;  %v1987_v2 = vadd.f32 %v4009_v63, %v5679_v35 }
 0x1bf   : > { %v4011_v58 = vpop.f32.mrf.mxu1  ;;  %v5865_v48 = vpop.f32.mrf.mxu0 }
 0x1c0   : > { %v4012_v13 = vadd.f32 %v4011_v58, %v4010_v40  ;;  %v5868_v36 = vadd.f32 %v5763_v8, %v1987_v2 }
 0x1c1   : > { %v4013_v44 = vpop.f32.mrf.mxu1  ;;  %v5870_v25 = vpop.f32.mrf.mxu0 }
 0x1c2   : > { %6166 = vst [vmem:[#allocation15_spill] sm:$0xff] %v5868_v36  ;;  %v1992_v39 = vadd.f32 %v4012_v13, %v5666_v1 }
 0x1c3   : > { %v4014_v49 = vpop.f32.mrf.mxu1  ;;  %v5873_v14 = vpop.f32.mrf.mxu0 }
 0x1c4   : > { %v4015_v9 = vadd.f32 %v4014_v49, %v4013_v44  ;;  %v5876_v29 = vadd.f32 %v5753_v21, %v1992_v39 }
 0x1c5   : > { %v4016_v35 = vpop.f32.mrf.mxu1  ;;  %v5878_v63 = vpop.f32.mrf.mxu0 }
 0x1c6   : > { %6167 = vst [vmem:[#allocation16_spill] sm:$0xff] %v5876_v29  ;;  %v1995_v40 = vadd.f32 %v4015_v9, %v5675_v6 }
 0x1c7   : > { %v4017_v58 = vpop.f32.mrf.mxu1  ;;  %v5881_v8 = vpop.f32.mrf.mxu0 }
 0x1c8   : > { %v4018_v2 = vadd.f32 %v4017_v58, %v4016_v35  ;;  %v5884_v36 = vadd.f32 %v5760_v7, %v1995_v40 }
 0x1c9   : > { %v4019_v1 = vpop.f32.mrf.mxu1  ;;  %v5886_v13 = vpop.f32.mrf.mxu0 }
 0x1ca   : > { %6168 = vst [vmem:[#allocation17_spill] sm:$0xff] %v5884_v36  ;;  %v2000_v44 = vadd.f32 %v4018_v2, %v5688_v0 }
 0x1cb   : > { %v4020_v49 = vpop.f32.mrf.mxu1  ;;  %v5889_v21 = vpop.f32.mrf.mxu0 }
 0x1cc   : > { %v4021_v39 = vadd.f32 %v4020_v49, %v4019_v1  ;;  %v5892_v29 = vadd.f32 %v5770_v43, %v2000_v44 }
 0x1cd   : > { %v4022_v6 = vpop.f32.mrf.mxu1  ;;  %v5894_v9 = vpop.f32.mrf.mxu0 }
 0x1ce   : > { %v2003_v35 = vadd.f32 %v4021_v39, %v5696_v33  ;;  %v4076_v33 = vadd.f32 %v5801_v28, %v5798_v3  ;;  %v4079_v28 = vadd.f32 %v5809_v38, %v5806_v18  ;;  %v4088_v18 = vadd.f32 %v5833_v57, %v5830_v42 }
 0x1cf   : > { %v4023_v7 = vpop.f32.mrf.mxu1  ;;  %v5897_v40 = vpop.f32.mrf.mxu0 }
 0x1d0   : > { %v4024_v58 = vadd.f32 %v4023_v7, %v4022_v6  ;;  %v5900_v36 = vadd.f32 %v5777_v4, %v2003_v35  ;;  %v4070_v4 = vadd.f32 %v5785_v24, %v5782_v54 }
 0x1d1   : > { %v4025_v0 = vpop.f32.mrf.mxu1  ;;  %v5902_v2 = vpop.f32.mrf.mxu0 }
 0x1d2   : > { %6169 = vst [vmem:[#allocation18_spill] sm:$0xff] %v5900_v36  ;;  %v5905_v43 = vadd.f32 %v4024_v58, %v5685_v11  ;;  %v5922_v11 = vld [vmem:[%s6152_s2] ss:$0 sm:$0xff] }
 0x1d3   : > { %v4026_v1 = vpop.f32.mrf.mxu1  ;;  %v5907_v44 = vpop.f32.mrf.mxu0 }
 0x1d4   : > { %v4027_v49 = vadd.f32 %v4026_v1, %v4025_v0 }
 0x1d5   : > { %v5911_v39 = vpop.f32.mrf.mxu0  ;;  %v4302_v6 = vpop.f32.mrf.mxu1 }
 0x1d6   : > { %v5917_v35 = vadd.f32 %v4027_v49, %v5693_v10  ;;  %v3037_v7 = vadd.f32 %v4302_v6, %v4076_v33  ;;  %v4073_v6 = vadd.f32 %v5793_v60, %v5790_v56 }
 0x1d7   : > { %v5924_v58 = vpop.f32.mrf.mxu0  ;;  %v3028_v3 = vpop.f32.mrf.mxu1 }
 0x1d8   : > { %6170 = vst [vmem:[#allocation19_spill] sm:$0xff] %v5917_v35  ;;  %v3157_v0 = vadd.f32 %v3037_v7, %v5707_v23  ;;  %v3029_v54 = vadd.f32 %v4070_v4, %v3028_v3 }
 0x1d9   : > { %v5931_v24 = vpop.f32.mrf.mxu0  ;;  %v4303_v10 = vpop.f32.mrf.mxu1 }
 0x1da   : > { %v3196_v1 = vadd.f32 %v5922_v11, %v3157_v0  ;;  %v3155_v33 = vadd.f32 %v3029_v54, %v5701_v32  ;;  %v3040_v49 = vadd.f32 %v4303_v10, %v4079_v28  ;;  %v4082_v32 = vadd.f32 %v5817_v50, %v5814_v31 }
 0x1db   : > { %v5937_v36 = vpop.f32.mrf.mxu0  ;;  %v3031_v35 = vpop.f32.mrf.mxu1  ;;  %v4091_v28 = vadd.f32 %v5841_v12, %v5838_v41  ;;  %v4085_v41 = vadd.f32 %v5825_v37, %v5822_v52  ;;  %v4094_v52 = vadd.f32 %v5849_v45, %v5846_v20 }
 0x1dc   : > { %v3228_v38 = vmax.f32 %v3196_v1, 0.0  ;;  %v3194_v23 = vadd.f32 %v5922_v11, %v3155_v33  ;;  %v3158_v4 = vadd.f32 %v3040_v49, %v5710_v19  ;;  %v3032_v7 = vadd.f32 %v4073_v6, %v3031_v35 }
 0x1dd   : > { %v5943_v3 = vpop.f32.mrf.mxu0  ;;  %v4306_v0 = vpop.f32.mrf.mxu1 }
 0x1de   : > { %3260 = vst [vmem:[%s5947_s5 + $0x10] sm:$0xff] %v3228_v38  ;;  %v3226_v56 = vmax.f32 %v3194_v23, 0.0  ;;  %v3197_v60 = vadd.f32 %v5922_v11, %v3158_v4  ;;  %v3053_v42 = vadd.f32 %v4306_v0, %v4088_v18  ;;  %v3156_v57 = vadd.f32 %v3032_v7, %v5704_v62 }
 0x1df   : > { %v5952_v19 = vpop.f32.mrf.mxu0  ;;  %v3044_v35 = vpop.f32.mrf.mxu1  ;;  %v4100_v38 = vadd.f32 %v5865_v48, %v5862_v15 }
 0x1e0   : > { %3258 = vst [vmem:[%s5947_s5] sm:$0xff] %v3226_v56  ;;  %v3229_v31 = vmax.f32 %v3197_v60, 0.0  ;;  %v3161_v50 = vadd.f32 %v3053_v42, %v5723_v30  ;;  %v3045_v54 = vadd.f32 %v4082_v32, %v3044_v35  ;;  %v3195_v10 = vadd.f32 %v5922_v11, %v3156_v57 }
 0x1e1   : > { %v5959_v1 = vpop.f32.mrf.mxu0  ;;  %v4307_v33 = vpop.f32.mrf.mxu1 }
 0x1e2   : > { %3261 = vst [vmem:[%s5947_s5 + $0x18] sm:$0xff] %v3229_v31  ;;  %v3200_v62 = vadd.f32 %v5922_v11, %v3161_v50  ;;  %v3159_v49 = vadd.f32 %v3045_v54, %v5713_v5  ;;  %v3056_v6 = vadd.f32 %v4307_v33, %v4091_v28  ;;  %v3227_v12 = vmax.f32 %v3195_v10, 0.0 }
 0x1e3   : > { %v5966_v18 = vpop.f32.mrf.mxu0  ;;  %v3047_v30 = vpop.f32.mrf.mxu1  ;;  %v4112_v33 = vadd.f32 %v5897_v40, %v5894_v9 }
 0x1e4   : > { %v3232_v23 = vmax.f32 %v3200_v62, 0.0  ;;  %v3198_v4 = vadd.f32 %v5922_v11, %v3159_v49  ;;  %v3162_v7 = vadd.f32 %v3056_v6, %v5730_v22  ;;  %3259 = vst [vmem:[%s5947_s5 + $0x8] sm:$0xff] %v3227_v12  ;;  %v3048_v0 = vadd.f32 %v4085_v41, %v3047_v30 }
 0x1e5   : > { %v5973_v5 = vpop.f32.mrf.mxu0  ;;  %v4310_v32 = vpop.f32.mrf.mxu1  ;;  %v4103_v22 = vadd.f32 %v5873_v14, %v5870_v25  ;;  %v4097_v25 = vadd.f32 %v5857_v61, %v5854_v26  ;;  %v4106_v26 = vadd.f32 %v5881_v8, %v5878_v63 }
 0x1e6   : > { %3264 = vst [vmem:[%s5947_s5 + $0x30] sm:$0xff] %v3232_v23  ;;  %v3230_v37 = vmax.f32 %v3198_v4, 0.0  ;;  %v3201_v56 = vadd.f32 %v5922_v11, %v3162_v7  ;;  %v3069_v15 = vadd.f32 %v4310_v32, %v4100_v38  ;;  %v3160_v48 = vadd.f32 %v3048_v0, %v5718_v47 }
 0x1e7   : > { %v5980_v60 = vpop.f32.mrf.mxu0  ;;  %v3060_v42 = vpop.f32.mrf.mxu1 }
 0x1e8   : > { %3262 = vst [vmem:[%s5947_s5 + $0x20] sm:$0xff] %v3230_v37  ;;  %v3233_v57 = vmax.f32 %v3201_v56, 0.0  ;;  %v3165_v35 = vadd.f32 %v3069_v15, %v5751_v51  ;;  %v3061_v28 = vadd.f32 %v4094_v52, %v3060_v42  ;;  %v3199_v20 = vadd.f32 %v5922_v11, %v3160_v48 }
 0x1e9   : > { %v5987_v45 = vpop.f32.mrf.mxu0  ;;  %v4311_v31 = vpop.f32.mrf.mxu1 }
 0x1ea   : > { %3265 = vst [vmem:[%s5947_s5 + $0x38] sm:$0xff] %v3233_v57  ;;  %v3204_v47 = vadd.f32 %v5922_v11, %v3165_v35  ;;  %v3163_v50 = vadd.f32 %v3061_v28, %v5737_v34  ;;  %v3072_v54 = vadd.f32 %v4311_v31, %v4103_v22  ;;  %v3231_v14 = vmax.f32 %v3199_v20, 0.0 }
 0x1eb   : > { %v5994_v10 = vpop.f32.mrf.mxu0  ;;  %v3063_v51 = vpop.f32.mrf.mxu1 }
 0x1ec   : > { %v3236_v62 = vmax.f32 %v3204_v47, 0.0  ;;  %v3202_v49 = vadd.f32 %v5922_v11, %v3163_v50  ;;  %v3166_v6 = vadd.f32 %v3072_v54, %v5758_v53  ;;  %3263 = vst [vmem:[%s5947_s5 + $0x28] sm:$0xff] %v3231_v14  ;;  %v3064_v41 = vadd.f32 %v4097_v25, %v3063_v51 }
 0x1ed   : > { %v4134_v34 = vpop.f32.mrf.mxu0  ;;  %v4314_v12 = vpop.f32.mrf.mxu1  ;;  %v4115_v53 = vadd.f32 %v5907_v44, %v5902_v2  ;;  %v4109_v2 = vadd.f32 %v5889_v21, %v5886_v13  ;;  %v4118_v13 = vadd.f32 %v5924_v58, %v5911_v39 }
 0x1ee   : > { %3268 = vst [vmem:[%s5947_s5 + $0x50] sm:$0xff] %v3236_v62  ;;  %v3234_v61 = vmax.f32 %v3202_v49, 0.0  ;;  %v3205_v30 = vadd.f32 %v5922_v11, %v3166_v6  ;;  %v3085_v38 = vadd.f32 %v4314_v12, %v4112_v33  ;;  %v3164_v9 = vadd.f32 %v3064_v41, %v5744_v55  ;;  %v6172_v12 = vld [vmem:[#allocation9_spill] sm:$0xff] }
 0x1ef   : > { %v4135_v40 = vpop.f32.mrf.mxu0  ;;  %v3076_v23 = vpop.f32.mrf.mxu1 }
 0x1f0   : > { %3266 = vst [vmem:[%s5947_s5 + $0x40] sm:$0xff] %v3234_v61  ;;  %v3237_v4 = vmax.f32 %v3205_v30, 0.0  ;;  %v3169_v7 = vadd.f32 %v3085_v38, %v5780_v16  ;;  %v3077_v0 = vadd.f32 %v4106_v26, %v3076_v23  ;;  %v3203_v63 = vadd.f32 %v5922_v11, %v3164_v9 }
 0x1f1   : > { %v4137_v8 = vpop.f32.mrf.mxu0  ;;  %v4315_v32 = vpop.f32.mrf.mxu1  ;;  %v4124_v16 = vadd.f32 %v5952_v19, %v5943_v3  ;;  %v4136_v49 = vadd.f32 %v4135_v40, %v4134_v34  ;;  %v4130_v9 = vadd.f32 %v5980_v60, %v5973_v5  ;;  %v6173_v34 = vld [vmem:[#allocation8_spill] sm:$0xff] }
 0x1f2   : > { %3269 = vst [vmem:[%s5947_s5 + $0x58] sm:$0xff] %v3237_v4  ;;  %v3208_v52 = vadd.f32 %v5922_v11, %v3169_v7  ;;  %v3167_v55 = vadd.f32 %v3077_v0, %v5765_v27  ;;  %v3088_v37 = vadd.f32 %v4315_v32, %v4115_v53  ;;  %v3235_v44 = vmax.f32 %v3203_v63, 0.0  ;;  %v6174_v63 = vld [vmem:[#allocation12_spill] sm:$0xff] }
 0x1f3   : > { %v4138_v56 = vpop.f32.mrf.mxu0  ;;  %v3079_v15 = vpop.f32.mrf.mxu1 }
 0x1f4   : > { %v3240_v48 = vmax.f32 %v3208_v52, 0.0  ;;  %v3206_v42 = vadd.f32 %v5922_v11, %v3167_v55  ;;  %v3170_v22 = vadd.f32 %v3088_v37, %v5788_v59  ;;  %3267 = vst [vmem:[%s5947_s5 + $0x48] sm:$0xff] %v3235_v44  ;;  %v3080_v57 = vadd.f32 %v4109_v2, %v3079_v15  ;;  %v6175_v2 = vld [vmem:[#allocation10_spill] sm:$0xff] }
 0x1f5   : > { %v6021_v35 = vpop.f32.mrf.mxu0  ;;  %v4318_v27 = vpop.f32.mrf.mxu1  ;;  %v4127_v59 = vadd.f32 %v5966_v18, %v5959_v1  ;;  %v4121_v1 = vadd.f32 %v5937_v36, %v5931_v24  ;;  %v4139_v7 = vadd.f32 %v4138_v56, %v4137_v8  ;;  %v4133_v8 = vadd.f32 %v5994_v10, %v5987_v45 }
 0x1f6   : > { %3272 = vst [vmem:[%s5947_s5 + $0x70] sm:$0xff] %v3240_v48  ;;  %v3238_v21 = vmax.f32 %v3206_v42, 0.0  ;;  %v3209_v28 = vadd.f32 %v5922_v11, %v3170_v22  ;;  %v3101_v3 = vadd.f32 %v4318_v27, %v4124_v16  ;;  %v3168_v19 = vadd.f32 %v3080_v57, %v5772_v46  ;;  %v6171_v46 = vld [vmem:[#allocation7_spill] sm:$0xff]  ;;  %v6176_v27 = vld [vmem:[#allocation13_spill] sm:$0xff] }
 0x1f7   : > { %v4141_v20 = vpop.f32.mrf.mxu0  ;;  %v3092_v31 = vpop.f32.mrf.mxu1 }
 0x1f8   : > { %3270 = vst [vmem:[%s5947_s5 + $0x60] sm:$0xff] %v3238_v21  ;;  %v3241_v47 = vmax.f32 %v3209_v28, 0.0  ;;  %v3173_v50 = vadd.f32 %v3101_v3, %v5812_v17  ;;  %v3093_v54 = vadd.f32 %v4118_v13, %v3092_v31  ;;  %v3207_v39 = vadd.f32 %v5922_v11, %v3168_v19 }
 0x1f9   : > { %v6033_v58 = vpop.f32.mrf.mxu0  ;;  %v4319_v25 = vpop.f32.mrf.mxu1  ;;  %v4142_v19 = vadd.f32 %v4141_v20, %v6021_v35 }
 0x1fa   : > { %3273 = vst [vmem:[%s5947_s5 + $0x78] sm:$0xff] %v3241_v47  ;;  %v3212_v14 = vadd.f32 %v5922_v11, %v3173_v50  ;;  %v3171_v51 = vadd.f32 %v3093_v54, %v6171_v46  ;;  %v3104_v33 = vadd.f32 %v4319_v25, %v4127_v59  ;;  %v3239_v18 = vmax.f32 %v3207_v39, 0.0  ;;  %v6177_v59 = vld [vmem:[#allocation11_spill] sm:$0xff] }
 0x1fb   : > { %v4144_v62 = vpop.f32.mrf.mxu0  ;;  %v3095_v17 = vpop.f32.mrf.mxu1 }
 0x1fc   : > { %v3244_v6 = vmax.f32 %v3212_v14, 0.0  ;;  %v3210_v41 = vadd.f32 %v5922_v11, %v3171_v51  ;;  %v3174_v26 = vadd.f32 %v3104_v33, %v6172_v12  ;;  %3271 = vst [vmem:[%s5947_s5 + $0x68] sm:$0xff] %v3239_v18  ;;  %v3096_v61 = vadd.f32 %v4121_v1, %v3095_v17  ;;  %v6178_v14 = vld [vmem:[#allocation16_spill] sm:$0xff]  ;;  %v6179_v18 = vld [vmem:[#allocation14_spill] sm:$0xff] }
 0x1fd   : > { %v4146_v30 = vpop.f32.mrf.mxu0  ;;  %v4322_v38 = vpop.f32.mrf.mxu1 }
 0x1fe   : > { %3276 = vst [vmem:[%s5947_s5 + $0x90] sm:$0xff] %v3244_v6  ;;  %v3242_v36 = vmax.f32 %v3210_v41, 0.0  ;;  %v3213_v24 = vadd.f32 %v5922_v11, %v3174_v26  ;;  %v3117_v23 = vadd.f32 %v4322_v38, %v4136_v49  ;;  %v3172_v40 = vadd.f32 %v3096_v61, %v6173_v34  ;;  %v6180_v38 = vld [vmem:[#allocation17_spill] sm:$0xff] }
 0x1ff   : > { %v4147_v53 = vpop.f32.mrf.mxu0  ;;  %v3108_v4 = vpop.f32.mrf.mxu1  ;;  %v4145_v6 = vadd.f32 %v4144_v62, %v6033_v58  ;;  %v6181_v58 = vld [vmem:[#allocation15_spill] sm:$0xff] }
 0x200   : > { %3274 = vst [vmem:[%s5947_s5 + $0x80] sm:$0xff] %v3242_v36  ;;  %v3245_v0 = vmax.f32 %v3213_v24, 0.0  ;;  %v3177_v32 = vadd.f32 %v3117_v23, %v6174_v63  ;;  %v3109_v52 = vadd.f32 %v4130_v9, %v3108_v4  ;;  %v3211_v55 = vadd.f32 %v5922_v11, %v3172_v40 }
 0x201   : > { %v4149_v5 = vpop.f32.mrf.mxu0  ;;  %v4323_v60 = vpop.f32.mrf.mxu1  ;;  %v4148_v22 = vadd.f32 %v4147_v53, %v4146_v30 }
 0x202   : > { %3277 = vst [vmem:[%s5947_s5 + $0x98] sm:$0xff] %v3245_v0  ;;  %v3216_v37 = vadd.f32 %v5922_v11, %v3177_v32  ;;  %v3175_v44 = vadd.f32 %v3109_v52, %v6175_v2  ;;  %v3120_v15 = vadd.f32 %v4323_v60, %v4139_v7  ;;  %v3243_v56 = vmax.f32 %v3211_v55, 0.0  ;;  %v6182_v60 = vld [vmem:[#allocation5_spill] sm:$0xff] }
 0x203   : > { %v4150_v16 = vpop.f32.mrf.mxu0  ;;  %v3111_v48 = vpop.f32.mrf.mxu1 }
 0x204   : > { %v3248_v42 = vmax.f32 %v3216_v37, 0.0  ;;  %v3214_v57 = vadd.f32 %v5922_v11, %v3175_v44  ;;  %v3178_v13 = vadd.f32 %v3120_v15, %v6176_v27  ;;  %3275 = vst [vmem:[%s5947_s5 + $0x88] sm:$0xff] %v3243_v56  ;;  %v3112_v21 = vadd.f32 %v4133_v8, %v3111_v48  ;;  %v6183_v27 = vld [vmem:[#allocation19_spill] sm:$0xff] }
 0x205   : > { %v4152_v28 = vpop.f32.mrf.mxu0  ;;  %v4326_v3 = vpop.f32.mrf.mxu1  ;;  %v4151_v25 = vadd.f32 %v4150_v16, %v4149_v5  ;;  %v2169_v37 = vadd.f32 %v6182_v60, %v5905_v43 }
 0x206   : > { %3280 = vst [vmem:[%s5947_s5 + $0xb0] sm:$0xff] %v3248_v42  ;;  %v3246_v31 = vmax.f32 %v3214_v57, 0.0  ;;  %v3217_v45 = vadd.f32 %v5922_v11, %v3178_v13  ;;  %v3133_v10 = vadd.f32 %v4326_v3, %v4148_v22  ;;  %v3176_v47 = vadd.f32 %v3112_v21, %v6177_v59  ;;  %v6184_v13 = vld [vmem:[#allocation6_spill] sm:$0xff] }
 0x207   : > { %v4153_v50 = vpop.f32.mrf.mxu0  ;;  %v3124_v54 = vpop.f32.mrf.mxu1  ;;  %v2172_v43 = vadd.f32 %v6184_v13, %v6183_v27  ;;  %v6185_v3 = vld [vmem:[#allocation18_spill] sm:$0xff] }
 0x208   : > { %3278 = vst [vmem:[%s5947_s5 + $0xa0] sm:$0xff] %v3246_v31  ;;  %v3249_v39 = vmax.f32 %v3217_v45, 0.0  ;;  %v3181_v46 = vadd.f32 %v3133_v10, %v6178_v14  ;;  %v3125_v51 = vadd.f32 %v4142_v19, %v3124_v54  ;;  %v3215_v33 = vadd.f32 %v5922_v11, %v3176_v47 }
 0x209   : > { %v4155_v35 = vpop.f32.mrf.mxu0  ;;  %v4327_v20 = vpop.f32.mrf.mxu1  ;;  %v4154_v34 = vadd.f32 %v4153_v50, %v4152_v28 }
 0x20a   : > { %3281 = vst [vmem:[%s5947_s5 + $0xb8] sm:$0xff] %v3249_v39  ;;  %v3220_v1 = vadd.f32 %v5922_v11, %v3181_v46  ;;  %v3179_v17 = vadd.f32 %v3125_v51, %v6179_v18  ;;  %v3136_v49 = vadd.f32 %v4327_v20, %v4151_v25  ;;  %v3247_v41 = vmax.f32 %v3215_v33, 0.0 }
 0x20b   : > { %v4156_v12 = vpop.f32.mrf.mxu0  ;;  %v3127_v26 = vpop.f32.mrf.mxu1 }
 0x20c   : > { %v3252_v61 = vmax.f32 %v3220_v1, 0.0  ;;  %v3218_v30 = vadd.f32 %v5922_v11, %v3179_v17  ;;  %v3182_v9 = vadd.f32 %v3136_v49, %v6180_v38  ;;  %3279 = vst [vmem:[%s5947_s5 + $0xa8] sm:$0xff] %v3247_v41  ;;  %v3128_v36 = vadd.f32 %v4145_v6, %v3127_v26 }
 0x20d   : > { %v4158_v24 = vpop.f32.mrf.mxu0  ;;  %v4330_v23 = vpop.f32.mrf.mxu1  ;;  %v4157_v2 = vadd.f32 %v4156_v12, %v4155_v35 }
 0x20e   : > { %3284 = vst [vmem:[%s5947_s5 + $0xd0] sm:$0xff] %v3252_v61  ;;  %v3250_v40 = vmax.f32 %v3218_v30, 0.0  ;;  %v3221_v53 = vadd.f32 %v5922_v11, %v3182_v9  ;;  %v3180_v62 = vadd.f32 %v3128_v36, %v6181_v58 }
 0x20f   : > { %v4159_v4 = vpop.f32.mrf.mxu0  ;;  %v3140_v7 = vpop.f32.mrf.mxu1 }
 0x210   : > { %3282 = vst [vmem:[%s5947_s5 + $0xc0] sm:$0xff] %v3250_v40  ;;  %v3253_v0 = vmax.f32 %v3221_v53, 0.0  ;;  %v4160_v63 = vadd.f32 %v4159_v4, %v4158_v24  ;;  %v3141_v32 = vadd.f32 %v4154_v34, %v3140_v7  ;;  %v3219_v52 = vadd.f32 %v5922_v11, %v3180_v62 }
 0x211   : > { %v4161_v55 = vpop.f32.mrf.mxu0  ;;  %v4331_v5 = vpop.f32.mrf.mxu1 }
 0x212   : > { %3285 = vst [vmem:[%s5947_s5 + $0xd8] sm:$0xff] %v3253_v0  ;;  %v3149_v44 = vadd.f32 %v4330_v23, %v4160_v63  ;;  %v3183_v15 = vadd.f32 %v3141_v32, %v5892_v29  ;;  %v3251_v8 = vmax.f32 %v3219_v52, 0.0 }
 0x213   : > { %v4162_v56 = vpop.f32.mrf.mxu0  ;;  %v3143_v16 = vpop.f32.mrf.mxu1 }
 0x214   : > { %v3185_v48 = vadd.f32 %v3149_v44, %v2169_v37  ;;  %v3222_v42 = vadd.f32 %v5922_v11, %v3183_v15  ;;  %v4163_v22 = vadd.f32 %v4162_v56, %v4161_v55  ;;  %v3144_v57 = vadd.f32 %v4157_v2, %v3143_v16  ;;  %3283 = vst [vmem:[%s5947_s5 + $0xc8] sm:$0xff] %v3251_v8 }
 0x216   : > { %v3224_v21 = vadd.f32 %v5922_v11, %v3185_v48  ;;  %v3254_v28 = vmax.f32 %v3222_v42, 0.0  ;;  %v3152_v29 = vadd.f32 %v4331_v5, %v4163_v22  ;;  %v3184_v19 = vadd.f32 %v3144_v57, %v6185_v3 }
 0x218   : > { %v3256_v31 = vmax.f32 %v3224_v21, 0.0  ;;  %3286 = vst [vmem:[%s5947_s5 + $0xe0] sm:$0xff] %v3254_v28  ;;  %v3186_v45 = vadd.f32 %v3152_v29, %v2172_v43  ;;  %v3223_v10 = vadd.f32 %v5922_v11, %v3184_v19 }
 0x21a   : > { %3288 = vst [vmem:[%s5947_s5 + $0xf0] sm:$0xff] %v3256_v31  ;;  %v3225_v59 = vadd.f32 %v5922_v11, %v3186_v45  ;;  %v3255_v47 = vmax.f32 %v3223_v10, 0.0 }
 0x21c   : > { %v3257_v50 = vmax.f32 %v3225_v59, 0.0  ;;  %3287 = vst [vmem:[%s5947_s5 + $0xe8] sm:$0xff] %v3255_v47 }
 0x21e   : > { %3289 = vst [vmem:[%s5947_s5 + $0xf8] sm:$0xff] %v3257_v50 }
 0x21f   : > { %4587 = shalt.err (!%p4584_p5)
}
 0x220   : > { %s4588_s26 = scalar_lea.hbm %s6097_s11, 4096  ;;  %s4592_s6 = scalar_lea.hbm %s6153_s3, 8192 }
 0x221   : > { %p4589_p6 = scmp.ne.s32.totalorder %s6097_s11, %s4588_s26  ;;  %p4593_p10 = scmp.lt.s32.totalorder %s6097_s11, %s6153_s3 }
 0x222   : > { %p4594_p11 = scmp.lt.s32.totalorder %s4592_s6, %s4588_s26 }
 0x223   : > { %p4590_p7 = pnand %p4589_p6, %p4715_p4 }
 0x224   : > { %p4595_p12 = por %p4594_p11, %p4593_p10 }
 0x225   : > { %p4591_p9 = pneg %p4590_p7 }
 0x227   : > { %p4596_p13 = pnand %p4595_p12, %p4591_p9 }
 0x229   : > { %4599 = shalt.err (!%p4596_p13)
}
 0x22a   : > { %s4653_s4 = smov 128   ;;  %s4654_s5 = smov 8  }
 0x22b   : > { %4349 = dma.vmem_to_hbm [thread:$0]  (%p4715_p4), %s6099_s8, 4096, %s6097_s11, %s6105_s15, %s4653_s4, %s4653_s4, %s4654_s5  }
 0x22c PF: > { %p4355_p0 = scmp.ge.s32.totalorder %s4650_s17, 2  ;;  %s3320_s7 = sand.u32 1, %s4630_s12  }
 0x22d   : > { %s3321_s9 = scalar_lea.sflag [#allocation3], %s3320_s7 }
 0x22e   : > { %p4352_p1 = pnand %p4355_p0, %p4722_p8 }
 0x230   : > { %p4353_p2 = pneg %p4352_p1 }
 0x232   : > { %4625 = dma.done.wait (%p4353_p2), %s3321_s9, 4096  }
 0x233   : > { %4627 = vsyncadd (%p4353_p2), %s3321_s9, 4294963200  ;;  %s16_s17 = sadd.s32 1, %s4650_s17   ;;  %s6186_s12 = smov %s4634_s13 }
 0x234   : > { %p13_p3 = scmp.ge.s32.totalorder %s16_s17, 4   ;;  %s6187_s13 = smov %s4638_s14 }
 0x235   : > { %s6188_s14 = smov %s4728_s25  ;;  %s6189_s15 = smov %s4646_s16 }
 0x236   : > { %s6190_s16 = smov %s6192_s20  ;;  %15 = sbr.rel (!%p13_p3) target bundleno = 4 (0x4), region = 77 }
 0x23b   :  { %3326 = vsyncpa [#allocation3], 1 }
 0x23c   :  { %3328 = vsyncpa [#allocation3 + $0x1], 1 }

</bundles_post_ra>
